<compile_context>
chip_gen: v6e
topology: v6e:2x2x1
jax: 0.10.0
libtpu: 0.0.40
codegen_flags: <defaults>
</compile_context>

<pallas_src>
import numpy as np

import jax
import jax.numpy as jnp
from jax.experimental import pallas as pl
from jax.experimental.pallas import tpu as pltpu

NPAD = 128                 # lane-dense output width for every matmul
ACT_DTYPE = jnp.bfloat16   # MXU input / intermediate-activation storage dtype


# ---------------------------------------------------------------------------
# Pallas kernels
# ---------------------------------------------------------------------------
def _conv_pool_relu_kernel(p_ref, w_ref, b_ref, o_ref):
    """Fused conv (im2col matmul) + bias + 2x2 maxpool + ReLU.

    p_ref holds the 4 pool-corner patch matrices stacked on a leading axis
    (same row ordering), so max-of-4 of the matmul results is exactly
    MaxPool2d(2) of the conv output.  Bias is added after the max
    (max(y_i) + b == max(y_i + b)), then ReLU.  One stacked matmul per tile.
    """
    p = p_ref[...]                                     # (4, TM, K) bf16
    g, tm, k = p.shape
    y = jnp.dot(p.reshape(g * tm, k), w_ref[...],
                preferred_element_type=jnp.float32)    # (4*TM, 128) f32
    y0 = y[0 * tm:1 * tm]
    y1 = y[1 * tm:2 * tm]
    y2 = y[2 * tm:3 * tm]
    y3 = y[3 * tm:4 * tm]
    ym = jnp.maximum(jnp.maximum(y0, y1), jnp.maximum(y2, y3)) + b_ref[...]
    o_ref[...] = jnp.maximum(ym, 0.0).astype(o_ref.dtype)


def conv_pool_relu(patches, w_pad, b_pad, *, tm=2048):
    """patches: (4, out_rows, K) bf16; w_pad: (K, NPAD) bf16; b_pad: (1, NPAD) f32."""
    _, out_rows, K = patches.shape
    TM = min(tm, out_rows)                 # out_rows is always a multiple of 16 here
    grid = (pl.cdiv(out_rows, TM),)
    return pl.pallas_call(
        _conv_pool_relu_kernel,
        out_shape=jax.ShapeDtypeStruct((out_rows, NPAD), ACT_DTYPE),
        grid=grid,
        in_specs=[pl.BlockSpec((4, TM, K), lambda i: (0, i, 0)),
                  pl.BlockSpec((K, NPAD), lambda i: (0, 0)),
                  pl.BlockSpec((1, NPAD), lambda i: (0, 0))],
        out_specs=pl.BlockSpec((TM, NPAD), lambda i: (i, 0)),
        compiler_params=pltpu.CompilerParams(
            dimension_semantics=("parallel",)),
    )(patches, w_pad, b_pad)


def _fc_fused_kernel(x_ref, w1_ref, b1_ref, w2_ref, b2_ref, o_ref):
    """Fused Linear(320,50)+ReLU -> Linear(50,10)+Softmax; hidden stays on-chip."""
    h = jnp.dot(x_ref[...], w1_ref[...], preferred_element_type=jnp.float32)
    h = jnp.maximum(h + b1_ref[...], 0.0)
    # TODO(synk): nn.Dropout (after conv2 and between fc1/fc2) is identity in
    # eval mode; training-mode random masking not implemented.
    logits = jnp.dot(h.astype(w2_ref.dtype), w2_ref[...],
                     preferred_element_type=jnp.float32) + b2_ref[...]
    # b2 padding columns hold -1e30, so padded lanes contribute exp(.) == 0.
    logits = logits - jnp.max(logits, axis=1, keepdims=True)
    e = jnp.exp(logits)
    o_ref[...] = (e / jnp.sum(e, axis=1, keepdims=True)).astype(o_ref.dtype)


def fc_fused(x, w1p, b1p, w2p, b2p, *, tb=1024):
    B, F = x.shape
    TB = min(tb, B)
    grid = (pl.cdiv(B, TB),)
    return pl.pallas_call(
        _fc_fused_kernel,
        out_shape=jax.ShapeDtypeStruct((B, NPAD), jnp.float32),
        grid=grid,
        in_specs=[pl.BlockSpec((TB, F), lambda i: (i, 0)),
                  pl.BlockSpec((F, NPAD), lambda i: (0, 0)),
                  pl.BlockSpec((1, NPAD), lambda i: (0, 0)),
                  pl.BlockSpec((NPAD, NPAD), lambda i: (0, 0)),
                  pl.BlockSpec((1, NPAD), lambda i: (0, 0))],
        out_specs=pl.BlockSpec((TB, NPAD), lambda i: (i, 0)),
        compiler_params=pltpu.CompilerParams(
            dimension_semantics=("parallel",)),
    )(x, w1p, b1p, w2p, b2p)


# ---------------------------------------------------------------------------
# Glue (im2col grouped by pool corner) in plain JAX
# ---------------------------------------------------------------------------
def im2col_pool_patches(x, kh, kw, k_pad=None):
    """(B,H,W,C) NHWC -> (4, B*PH*PW, K) 'valid'-conv patch matrices, one per
    2x2 maxpool corner; column order (ky, kx, c) to match the OIHW ->
    (O,KH,KW,C) weight flattening.  Optionally zero-pads K to k_pad."""
    B, H, W, C = x.shape
    OH, OW = H - kh + 1, W - kw + 1
    PH, PW = OH // 2, OW // 2
    K = kh * kw * C
    groups = []
    for dy in range(2):
        for dx in range(2):
            cols = []
            for ky in range(kh):
                for kx in range(kw):
                    r0, c0 = dy + ky, dx + kx
                    cols.append(x[:, r0:r0 + 2 * PH:2, c0:c0 + 2 * PW:2, :])
            if k_pad is not None and k_pad > K:
                cols.append(jnp.zeros((B, PH, PW, k_pad - K), x.dtype))
            g = jnp.concatenate(cols, axis=-1).reshape(B * PH * PW, k_pad or K)
            groups.append(g)
    # TODO(synk): the materialized 4-corner patches duplicate the input ~18x;
    # an in-kernel strided-read im2col would remove this XLA-side HBM traffic.
    return jnp.stack(groups, axis=0), (PH, PW)


def _pad_cols(m, n_valid, fill=0.0, dtype=jnp.float32):
    """Embed an (R, n_valid) matrix into (R, NPAD) columns (rest = fill)."""
    R = m.shape[0]
    out = jnp.full((R, NPAD), fill, jnp.float32)
    return out.at[:, :n_valid].set(m.astype(jnp.float32)).astype(dtype)


def cnn_mnist_forward(x_nchw, params):
    B = x_nchw.shape[0]
    x = jnp.transpose(x_nchw, (0, 2, 3, 1)).astype(ACT_DTYPE)        # NHWC (B,28,28,1)

    # --- conv1 (1->10, k=5) + MaxPool2d(2) + ReLU, fused ---------------------
    p1, (PH1, PW1) = im2col_pool_patches(x, 5, 5)                    # (4, B*144, 25)
    w1 = jnp.transpose(params["conv1_w"], (0, 2, 3, 1)).reshape(10, 25).T
    w1p = _pad_cols(w1, 10, dtype=ACT_DTYPE)                         # (25,128) bf16
    b1p = _pad_cols(params["conv1_b"].reshape(1, 10), 10)            # (1,128) f32
    y1 = conv_pool_relu(p1, w1p, b1p)                                # (B*144,128) bf16
    y1 = y1.reshape(B, PH1, PW1, NPAD)[..., :10]                     # (B,12,12,10)

    # --- conv2 (10->20, k=5) + Dropout(identity) + MaxPool2d(2) + ReLU -------
    p2, (PH2, PW2) = im2col_pool_patches(y1, 5, 5, k_pad=256)        # (4, B*16, 256)
    w2 = jnp.transpose(params["conv2_w"], (0, 2, 3, 1)).reshape(20, 250).T
    w2p = jnp.zeros((256, NPAD), jnp.float32).at[:250, :20].set(w2).astype(ACT_DTYPE)
    b2p = _pad_cols(params["conv2_b"].reshape(1, 20), 20)            # (1,128) f32
    y2 = conv_pool_relu(p2, w2p, b2p)                                # (B*16,128) bf16
    y2 = y2.reshape(B, PH2, PW2, NPAD)[..., :20]                     # (B,4,4,20)

    # --- flatten in (h,w,c) order; PyTorch's (c,h,w) .view(-1,320) order is
    #     absorbed into a free fc1-weight row permutation (no activation
    #     transpose between kernels). -----------------------------------------
    feat = y2.reshape(B, 320)                                        # bf16
    perm = np.array([c * (PH2 * PW2) + h * PW2 + w
                     for h in range(PH2) for w in range(PW2) for c in range(20)])

    # --- fused fc1(+ReLU) -> fc2(+Softmax) -----------------------------------
    wf1 = jnp.zeros((320, NPAD), jnp.float32).at[:, :50].set(
        params["fc1_w"].T[perm]).astype(ACT_DTYPE)
    bf1 = _pad_cols(params["fc1_b"].reshape(1, 50), 50)
    wf2 = jnp.zeros((NPAD, NPAD), jnp.float32).at[:50, :10].set(
        params["fc2_w"].T).astype(ACT_DTYPE)
    bf2 = _pad_cols(params["fc2_b"].reshape(1, 10), 10, fill=-1e30)  # mask pad lanes
    probs = fc_fused(feat, wf1, bf1, wf2, bf2)                       # (B, 128) f32
    return probs[:, :10]


# ---------------------------------------------------------------------------
# Pure-JAX reference (for a light correctness check)
# ---------------------------------------------------------------------------
def reference_forward(x, params):
    dn = ("NCHW", "OIHW", "NCHW")
    y = jax.lax.conv_general_dilated(x, params["conv1_w"], (1, 1), "VALID",
                                     dimension_numbers=dn)
    y = y + params["conv1_b"][None, :, None, None]
    y = jax.lax.reduce_window(y, -jnp.inf, jax.lax.max, (1, 1, 2, 2),
                              (1, 1, 2, 2), "VALID")
    y = jnp.maximum(y, 0.0)
    y = jax.lax.conv_general_dilated(y, params["conv2_w"], (1, 1), "VALID",
                                     dimension_numbers=dn)
    y = y + params["conv2_b"][None, :, None, None]
    y = jax.lax.reduce_window(y, -jnp.inf, jax.lax.max, (1, 1, 2, 2),
                              (1, 1, 2, 2), "VALID")
    y = jnp.maximum(y, 0.0)
    y = y.reshape(y.shape[0], -1)
    y = jnp.maximum(y @ params["fc1_w"].T + params["fc1_b"], 0.0)
    y = y @ params["fc2_w"].T + params["fc2_b"]
    return jax.nn.softmax(y, axis=1)


# ---------------------------------------------------------------------------
# Deterministic parameter init (PyTorch-default-like uniform bounds)
# ---------------------------------------------------------------------------
def init_params(key):
    ks = jax.random.split(key, 8)

    def u(k, shape, fan_in):
        bound = 1.0 / (fan_in ** 0.5)
        return jax.random.uniform(k, shape, jnp.float32, -bound, bound)

    return {
        "conv1_w": u(ks[0], (10, 1, 5, 5), 1 * 5 * 5),
        "conv1_b": u(ks[1], (10,), 1 * 5 * 5),
        "conv2_w": u(ks[2], (20, 10, 5, 5), 10 * 5 * 5),
        "conv2_b": u(ks[3], (20,), 10 * 5 * 5),
        "fc1_w": u(ks[4], (50, 320), 320),
        "fc1_b": u(ks[5], (50,), 320),
        "fc2_w": u(ks[6], (10, 50), 50),
        "fc2_b": u(ks[7], (10,), 50),
    }


if __name__ == "__main__":
    root = jax.random.PRNGKey(0)
    pkey, xkey = jax.random.split(root)
    params = init_params(pkey)

    # MNIST-style input: the 320-feature flatten implies 1x28x28.
    x = jax.random.normal(xkey, (2, 1, 28, 28), dtype=jnp.float32)

    fwd = jax.jit(cnn_mnist_forward)
    probs = jax.block_until_ready(fwd(x, params))

    assert probs.shape == (2, 10), probs.shape
    assert bool(jnp.all(jnp.isfinite(probs)))
    assert bool(jnp.allclose(jnp.sum(probs, axis=1), 1.0, atol=1e-2))

    ref = jax.block_until_ready(reference_forward(x, params))
    assert bool(jnp.allclose(probs, ref, atol=2e-2)), jnp.max(jnp.abs(probs - ref))

    print("KERNEL_OK")
</pallas_src>

<mosaic_0001>
module attributes {stable_mosaic.version = 11 : i64} {
  func.func @_conv_pool_relu_kernel(%arg0: i32, %arg1: memref<4x288x25xbf16, #tpu.memory_space<vmem>>, %arg2: memref<25x128xbf16, #tpu.memory_space<vmem>>, %arg3: memref<1x128xf32, #tpu.memory_space<vmem>>, %arg4: memref<288x128xbf16, #tpu.memory_space<vmem>>) attributes {dimension_semantics = [#tpu.dimension_semantics<parallel>], iteration_bounds = array<i64: 1>, scalar_prefetch = 0 : i64, scratch_operands = 0 : i64, tpu.core_type = #tpu.core_type<tc>, window_params = [{transform_indices = @transform_0, window_bounds = array<i64: 4, 288, 25>}, {pipeline_mode = #tpu.pipeline_mode<synchronous>, transform_indices = @transform_1, window_bounds = array<i64: 25, 128>}, {pipeline_mode = #tpu.pipeline_mode<synchronous>, transform_indices = @transform_2, window_bounds = array<i64: 1, 128>}, {transform_indices = @transform_3, window_bounds = array<i64: 288, 128>}]} {
    %c0 = arith.constant 0 : index
    %c0_0 = arith.constant 0 : index
    %c0_1 = arith.constant 0 : index
    %0 = vector.load %arg1[%c0, %c0_0, %c0_1] : memref<4x288x25xbf16, #tpu.memory_space<vmem>>, vector<4x288x25xbf16>
    %1 = vector.shape_cast %0 : vector<4x288x25xbf16> to vector<1152x25xbf16>
    %c0_2 = arith.constant 0 : index
    %c0_3 = arith.constant 0 : index
    %2 = vector.load %arg2[%c0_2, %c0_3] : memref<25x128xbf16, #tpu.memory_space<vmem>>, vector<25x128xbf16>
    %cst = arith.constant dense<0.000000e+00> : vector<1152x128xf32>
    %3 = tpu.matmul %1, %2, %cst {dimension_numbers = #tpu.dot_dimension_numbers<[1], [0], [0], [1], [0, 0, 1, 1], [], []>} : vector<1152x25xbf16>, vector<25x128xbf16>, vector<1152x128xf32> -> vector<1152x128xf32>
    %4 = vector.extract_strided_slice %3 {offsets = [0, 0], sizes = [288, 128], strides = [1, 1]} : vector<1152x128xf32> to vector<288x128xf32>
    %5 = vector.extract_strided_slice %3 {offsets = [288, 0], sizes = [288, 128], strides = [1, 1]} : vector<1152x128xf32> to vector<288x128xf32>
    %6 = vector.extract_strided_slice %3 {offsets = [576, 0], sizes = [288, 128], strides = [1, 1]} : vector<1152x128xf32> to vector<288x128xf32>
    %7 = vector.extract_strided_slice %3 {offsets = [864, 0], sizes = [288, 128], strides = [1, 1]} : vector<1152x128xf32> to vector<288x128xf32>
    %8 = arith.maximumf %4, %5 : vector<288x128xf32>
    %9 = arith.maximumf %6, %7 : vector<288x128xf32>
    %10 = arith.maximumf %8, %9 : vector<288x128xf32>
    %c0_4 = arith.constant 0 : index
    %c0_5 = arith.constant 0 : index
    %11 = vector.load %arg3[%c0_4, %c0_5] : memref<1x128xf32, #tpu.memory_space<vmem>>, vector<1x128xf32>
    %12 = vector.broadcast %11 : vector<1x128xf32> to vector<288x128xf32>
    %13 = arith.addf %10, %12 : vector<288x128xf32>
    %cst_6 = arith.constant 0.000000e+00 : f32
    %14 = vector.broadcast %cst_6 : f32 to vector<288x128xf32>
    %15 = arith.maximumf %13, %14 : vector<288x128xf32>
    %16 = arith.truncf %15 : vector<288x128xf32> to vector<288x128xbf16>
    %c0_7 = arith.constant 0 : index
    %c0_8 = arith.constant 0 : index
    %17 = vector.load %arg4[%c0_7, %c0_8] : memref<288x128xbf16, #tpu.memory_space<vmem>>, vector<288x128xbf16>
    tpu.vector_store %arg4[%c0_7, %c0_8], %16 {strides = array<i32>} : memref<288x128xbf16, #tpu.memory_space<vmem>>, vector<288x128xbf16>,
    return
  }
  func.func @transform_0(%arg0: i32) -> (i32, i32, i32) {
    %c0_i32 = arith.constant 0 : i32
    %c0_i32_0 = arith.constant 0 : i32
    %c0_i32_1 = arith.constant 0 : i32
    return %c0_i32, %arg0, %c0_i32_0 : i32, i32, i32
  }
  func.func @transform_1(%arg0: i32) -> (i32, i32) {
    %c0_i32 = arith.constant 0 : i32
    %c0_i32_0 = arith.constant 0 : i32
    %c0_i32_1 = arith.constant 0 : i32
    return %c0_i32, %c0_i32_0 : i32, i32
  }
  func.func @transform_2(%arg0: i32) -> (i32, i32) {
    %c0_i32 = arith.constant 0 : i32
    %c0_i32_0 = arith.constant 0 : i32
    %c0_i32_1 = arith.constant 0 : i32
    return %c0_i32, %c0_i32_0 : i32, i32
  }
  func.func @transform_3(%arg0: i32) -> (i32, i32) {
    %c0_i32 = arith.constant 0 : i32
    %c0_i32_0 = arith.constant 0 : i32
    return %arg0, %c0_i32 : i32, i32
  }
}

module attributes {stable_mosaic.version = 11 : i64} {
  func.func @_conv_pool_relu_kernel(%arg0: i32, %arg1: memref<4x32x256xbf16, #tpu.memory_space<vmem>>, %arg2: memref<256x128xbf16, #tpu.memory_space<vmem>>, %arg3: memref<1x128xf32, #tpu.memory_space<vmem>>, %arg4: memref<32x128xbf16, #tpu.memory_space<vmem>>) attributes {dimension_semantics = [#tpu.dimension_semantics<parallel>], iteration_bounds = array<i64: 1>, scalar_prefetch = 0 : i64, scratch_operands = 0 : i64, tpu.core_type = #tpu.core_type<tc>, window_params = [{transform_indices = @transform_0, window_bounds = array<i64: 4, 32, 256>}, {pipeline_mode = #tpu.pipeline_mode<synchronous>, transform_indices = @transform_1, window_bounds = array<i64: 256, 128>}, {pipeline_mode = #tpu.pipeline_mode<synchronous>, transform_indices = @transform_2, window_bounds = array<i64: 1, 128>}, {transform_indices = @transform_3, window_bounds = array<i64: 32, 128>}]} {
    %c0 = arith.constant 0 : index
    %c0_0 = arith.constant 0 : index
    %c0_1 = arith.constant 0 : index
    %0 = vector.load %arg1[%c0, %c0_0, %c0_1] : memref<4x32x256xbf16, #tpu.memory_space<vmem>>, vector<4x32x256xbf16>
    %1 = vector.shape_cast %0 : vector<4x32x256xbf16> to vector<128x256xbf16>
    %c0_2 = arith.constant 0 : index
    %c0_3 = arith.constant 0 : index
    %2 = vector.load %arg2[%c0_2, %c0_3] : memref<256x128xbf16, #tpu.memory_space<vmem>>, vector<256x128xbf16>
    %cst = arith.constant dense<0.000000e+00> : vector<128x128xf32>
    %3 = tpu.matmul %1, %2, %cst {dimension_numbers = #tpu.dot_dimension_numbers<[1], [0], [0], [1], [0, 0, 1, 1], [], []>} : vector<128x256xbf16>, vector<256x128xbf16>, vector<128x128xf32> -> vector<128x128xf32>
    %4 = vector.extract_strided_slice %3 {offsets = [0, 0], sizes = [32, 128], strides = [1, 1]} : vector<128x128xf32> to vector<32x128xf32>
    %5 = vector.extract_strided_slice %3 {offsets = [32, 0], sizes = [32, 128], strides = [1, 1]} : vector<128x128xf32> to vector<32x128xf32>
    %6 = vector.extract_strided_slice %3 {offsets = [64, 0], sizes = [32, 128], strides = [1, 1]} : vector<128x128xf32> to vector<32x128xf32>
    %7 = vector.extract_strided_slice %3 {offsets = [96, 0], sizes = [32, 128], strides = [1, 1]} : vector<128x128xf32> to vector<32x128xf32>
    %8 = arith.maximumf %4, %5 : vector<32x128xf32>
    %9 = arith.maximumf %6, %7 : vector<32x128xf32>
    %10 = arith.maximumf %8, %9 : vector<32x128xf32>
    %c0_4 = arith.constant 0 : index
    %c0_5 = arith.constant 0 : index
    %11 = vector.load %arg3[%c0_4, %c0_5] : memref<1x128xf32, #tpu.memory_space<vmem>>, vector<1x128xf32>
    %12 = vector.broadcast %11 : vector<1x128xf32> to vector<32x128xf32>
    %13 = arith.addf %10, %12 : vector<32x128xf32>
    %cst_6 = arith.constant 0.000000e+00 : f32
    %14 = vector.broadcast %cst_6 : f32 to vector<32x128xf32>
    %15 = arith.maximumf %13, %14 : vector<32x128xf32>
    %16 = arith.truncf %15 : vector<32x128xf32> to vector<32x128xbf16>
    %c0_7 = arith.constant 0 : index
    %c0_8 = arith.constant 0 : index
    %17 = vector.load %arg4[%c0_7, %c0_8] : memref<32x128xbf16, #tpu.memory_space<vmem>>, vector<32x128xbf16>
    tpu.vector_store %arg4[%c0_7, %c0_8], %16 {strides = array<i32>} : memref<32x128xbf16, #tpu.memory_space<vmem>>, vector<32x128xbf16>,
    return
  }
  func.func @transform_0(%arg0: i32) -> (i32, i32, i32) {
    %c0_i32 = arith.constant 0 : i32
    %c0_i32_0 = arith.constant 0 : i32
    %c0_i32_1 = arith.constant 0 : i32
    return %c0_i32, %arg0, %c0_i32_0 : i32, i32, i32
  }
  func.func @transform_1(%arg0: i32) -> (i32, i32) {
    %c0_i32 = arith.constant 0 : i32
    %c0_i32_0 = arith.constant 0 : i32
    %c0_i32_1 = arith.constant 0 : i32
    return %c0_i32, %c0_i32_0 : i32, i32
  }
  func.func @transform_2(%arg0: i32) -> (i32, i32) {
    %c0_i32 = arith.constant 0 : i32
    %c0_i32_0 = arith.constant 0 : i32
    %c0_i32_1 = arith.constant 0 : i32
    return %c0_i32, %c0_i32_0 : i32, i32
  }
  func.func @transform_3(%arg0: i32) -> (i32, i32) {
    %c0_i32 = arith.constant 0 : i32
    %c0_i32_0 = arith.constant 0 : i32
    return %arg0, %c0_i32 : i32, i32
  }
}

module attributes {stable_mosaic.version = 11 : i64} {
  func.func @_fc_fused_kernel(%arg0: i32, %arg1: memref<2x320xbf16, #tpu.memory_space<vmem>>, %arg2: memref<320x128xbf16, #tpu.memory_space<vmem>>, %arg3: memref<1x128xf32, #tpu.memory_space<vmem>>, %arg4: memref<128x128xbf16, #tpu.memory_space<vmem>>, %arg5: memref<1x128xf32, #tpu.memory_space<vmem>>, %arg6: memref<2x128xf32, #tpu.memory_space<vmem>>) attributes {dimension_semantics = [#tpu.dimension_semantics<parallel>], iteration_bounds = array<i64: 1>, scalar_prefetch = 0 : i64, scratch_operands = 0 : i64, tpu.core_type = #tpu.core_type<tc>, window_params = [{transform_indices = @transform_0, window_bounds = array<i64: 2, 320>}, {pipeline_mode = #tpu.pipeline_mode<synchronous>, transform_indices = @transform_1, window_bounds = array<i64: 320, 128>}, {pipeline_mode = #tpu.pipeline_mode<synchronous>, transform_indices = @transform_2, window_bounds = array<i64: 1, 128>}, {pipeline_mode = #tpu.pipeline_mode<synchronous>, transform_indices = @transform_3, window_bounds = array<i64: 128, 128>}, {pipeline_mode = #tpu.pipeline_mode<synchronous>, transform_indices = @transform_4, window_bounds = array<i64: 1, 128>}, {transform_indices = @transform_5, window_bounds = array<i64: 2, 128>}]} {
    %c0 = arith.constant 0 : index
    %c0_0 = arith.constant 0 : index
    %0 = vector.load %arg1[%c0, %c0_0] : memref<2x320xbf16, #tpu.memory_space<vmem>>, vector<2x320xbf16>
    %c0_1 = arith.constant 0 : index
    %c0_2 = arith.constant 0 : index
    %1 = vector.load %arg2[%c0_1, %c0_2] : memref<320x128xbf16, #tpu.memory_space<vmem>>, vector<320x128xbf16>
    %cst = arith.constant dense<0.000000e+00> : vector<2x128xf32>
    %2 = tpu.matmul %0, %1, %cst {dimension_numbers = #tpu.dot_dimension_numbers<[1], [0], [0], [1], [0, 0, 1, 1], [], []>} : vector<2x320xbf16>, vector<320x128xbf16>, vector<2x128xf32> -> vector<2x128xf32>
    %c0_3 = arith.constant 0 : index
    %c0_4 = arith.constant 0 : index
    %3 = vector.load %arg3[%c0_3, %c0_4] : memref<1x128xf32, #tpu.memory_space<vmem>>, vector<1x128xf32>
    %4 = vector.broadcast %3 : vector<1x128xf32> to vector<2x128xf32>
    %5 = arith.addf %2, %4 : vector<2x128xf32>
    %cst_5 = arith.constant 0.000000e+00 : f32
    %6 = vector.broadcast %cst_5 : f32 to vector<2x128xf32>
    %7 = arith.maximumf %5, %6 : vector<2x128xf32>
    %8 = arith.truncf %7 : vector<2x128xf32> to vector<2x128xbf16>
    %c0_6 = arith.constant 0 : index
    %c0_7 = arith.constant 0 : index
    %9 = vector.load %arg4[%c0_6, %c0_7] : memref<128x128xbf16, #tpu.memory_space<vmem>>, vector<128x128xbf16>
    %cst_8 = arith.constant dense<0.000000e+00> : vector<2x128xf32>
    %10 = tpu.matmul %8, %9, %cst_8 {dimension_numbers = #tpu.dot_dimension_numbers<[1], [0], [0], [1], [0, 0, 1, 1], [], []>} : vector<2x128xbf16>, vector<128x128xbf16>, vector<2x128xf32> -> vector<2x128xf32>
    %c0_9 = arith.constant 0 : index
    %c0_10 = arith.constant 0 : index
    %11 = vector.load %arg5[%c0_9, %c0_10] : memref<1x128xf32, #tpu.memory_space<vmem>>, vector<1x128xf32>
    %12 = vector.broadcast %11 : vector<1x128xf32> to vector<2x128xf32>
    %13 = arith.addf %10, %12 : vector<2x128xf32>
    %cst_11 = arith.constant dense<0xFF800000> : vector<2xf32>
    %14 = vector.multi_reduction <maximumf>, %13, %cst_11 [1] : vector<2x128xf32> to vector<2xf32>
    %15 = vector.shape_cast %14 : vector<2xf32> to vector<2x1xf32>
    %16 = vector.broadcast %15 : vector<2x1xf32> to vector<2x128xf32>
    %17 = arith.subf %13, %16 : vector<2x128xf32>
    %18 = math.exp %17 : vector<2x128xf32>
    %cst_12 = arith.constant dense<0.000000e+00> : vector<2xf32>
    %19 = vector.multi_reduction <add>, %18, %cst_12 [1] : vector<2x128xf32> to vector<2xf32>
    %20 = vector.shape_cast %19 : vector<2xf32> to vector<2x1xf32>
    %21 = vector.broadcast %20 : vector<2x1xf32> to vector<2x128xf32>
    %22 = arith.divf %18, %21 : vector<2x128xf32>
    %c0_13 = arith.constant 0 : index
    %c0_14 = arith.constant 0 : index
    %23 = vector.load %arg6[%c0_13, %c0_14] : memref<2x128xf32, #tpu.memory_space<vmem>>, vector<2x128xf32>
    tpu.vector_store %arg6[%c0_13, %c0_14], %22 {strides = array<i32>} : memref<2x128xf32, #tpu.memory_space<vmem>>, vector<2x128xf32>,
    return
  }
  func.func @transform_0(%arg0: i32) -> (i32, i32) {
    %c0_i32 = arith.constant 0 : i32
    %c0_i32_0 = arith.constant 0 : i32
    return %arg0, %c0_i32 : i32, i32
  }
  func.func @transform_1(%arg0: i32) -> (i32, i32) {
    %c0_i32 = arith.constant 0 : i32
    %c0_i32_0 = arith.constant 0 : i32
    %c0_i32_1 = arith.constant 0 : i32
    return %c0_i32, %c0_i32_0 : i32, i32
  }
  func.func @transform_2(%arg0: i32) -> (i32, i32) {
    %c0_i32 = arith.constant 0 : i32
    %c0_i32_0 = arith.constant 0 : i32
    %c0_i32_1 = arith.constant 0 : i32
    return %c0_i32, %c0_i32_0 : i32, i32
  }
  func.func @transform_3(%arg0: i32) -> (i32, i32) {
    %c0_i32 = arith.constant 0 : i32
    %c0_i32_0 = arith.constant 0 : i32
    %c0_i32_1 = arith.constant 0 : i32
    return %c0_i32, %c0_i32_0 : i32, i32
  }
  func.func @transform_4(%arg0: i32) -> (i32, i32) {
    %c0_i32 = arith.constant 0 : i32
    %c0_i32_0 = arith.constant 0 : i32
    %c0_i32_1 = arith.constant 0 : i32
    return %c0_i32, %c0_i32_0 : i32, i32
  }
  func.func @transform_5(%arg0: i32) -> (i32, i32) {
    %c0_i32 = arith.constant 0 : i32
    %c0_i32_0 = arith.constant 0 : i32
    return %arg0, %c0_i32 : i32, i32
  }
}

</mosaic_0001>

<bundles_post_ra>
// kernel: cnn_mnist_forward.3
= control target key start
LH: loop header
LB: loop body
LE: loop exit
PB: predicated region body
PF: predicated region fallthrough
CT: control target
= control target key end

     0   :  { %vm751_vm0 = vcmask 1043456   ;;  %vm752_vm1 = vcmask 1044480   ;;  %v2365_v1 = vmov 65535   ;;  %vm534_vm2 = vcmask 203776   ;;  %s2991_s1 = inlined_call_operand.vmem [shape: bf16[25,128], index: 1, kind: input, shape index: {}]   ;;  %s2992_s0 = inlined_call_operand.vmem [shape: bf16[4,288,25], index: 0, kind: input, shape index: {}]   ;;  %s2993_s2 = inlined_call_operand.vmem [shape: f32[1,128], index: 2, kind: input, shape index: {}]   ;;  %s2994_s3 = inlined_call_operand.vmem [shape: bf16[288,128], index: 3, kind: output, shape index: {}]  }
   0x1   :  { %v2291_v0 = vld [vmem:[%s2991_s1 + $0x8] sm:$0x1f]   ;;  %v753_v2 = vsel %vm751_vm0, 4294967295, %v2365_v1  ;;  %v2293_v4 = vld [vmem:[%s2992_s0] sm:$0xff]   ;;  %v2297_v10 = vld [vmem:[%s2992_s0 + $0x10] sm:$0xff]  }
   0x2   :  { %v754_v3 = vsel %vm752_vm1, %v753_v2, 0  ;;  %v2292_v6 = vld [vmem:[%s2991_s1] sm:$0xff]   ;;  %2142 = vmatprep.mubr.msk.bf16.mxu0 %vm534_vm2, %v2293_v4  ;;  %v2295_v8 = vld [vmem:[%s2992_s0 + $0x8] sm:$0xff]   ;;  %v2298_v11 = vld [vmem:[%s2992_s0 + $0x130] sm:$0xff]  }
   0x3   :  { %v756_v5 = vand.u32 %v2291_v0, %v754_v3  ;;  %v2294_v7 = vld [vmem:[%s2992_s0 + $0x120] sm:$0xff]   ;;  %v2296_v9 = vld [vmem:[%s2992_s0 + $0x128] sm:$0xff]   ;;  %v2299_v12 = vld [vmem:[%s2992_s0 + $0x18] sm:$0xff]  }
   0x4   :  { %2214 = vmatprep.mubr.msk.bf16.mxu1 %vm534_vm2, %v2294_v7  ;;  %v2300_v13 = vld [vmem:[%s2992_s0 + $0x138] sm:$0xff]   ;;  %v2301_v14 = vld [vmem:[%s2992_s0 + $0x20] sm:$0xff]   ;;  %v2303_v16 = vld [vmem:[%s2992_s0 + $0x28] sm:$0xff]  }
   0x5   :  { %2138 = vmatprep.subr.bf16.mxu0 %v756_v5  ;;  %2286 = vmatprep.subr.bf16.mxu1 %v756_v5  ;;  %v2302_v15 = vld [vmem:[%s2992_s0 + $0x140] sm:$0xff]   ;;  %v2304_v17 = vld [vmem:[%s2992_s0 + $0x148] sm:$0xff]   ;;  %v2305_v18 = vld [vmem:[%s2992_s0 + $0x30] sm:$0xff]  }
   0x6   :  { %2139 = vmatpush3.bf16.msra.mxu0 %v756_v5  ;;  %2288 = vmatpush3.bf16.msra.mxu1 %v756_v5  ;;  %v2306_v19 = vld [vmem:[%s2992_s0 + $0x150] sm:$0xff]   ;;  %v2307_v20 = vld [vmem:[%s2992_s0 + $0x38] sm:$0xff]   ;;  %v2309_v22 = vld [vmem:[%s2992_s0 + $0x40] sm:$0xff]  }
   0x7   :  { %2140 = vmatprep.subr.bf16.mxu0 %v2292_v6  ;;  %2287 = vmatprep.subr.bf16.mxu1 %v2292_v6  ;;  %v2308_v21 = vld [vmem:[%s2992_s0 + $0x158] sm:$0xff]   ;;  %v2310_v23 = vld [vmem:[%s2992_s0 + $0x160] sm:$0xff]   ;;  %v2311_v24 = vld [vmem:[%s2992_s0 + $0x48] sm:$0xff]  }
   0x8   :  { %v2312_v25 = vld [vmem:[%s2992_s0 + $0x168] sm:$0xff]   ;;  %v2313_v26 = vld [vmem:[%s2992_s0 + $0x50] sm:$0xff]   ;;  %v2315_v28 = vld [vmem:[%s2992_s0 + $0x58] sm:$0xff]  }
   0x9   :  { %v2314_v27 = vld [vmem:[%s2992_s0 + $0x170] sm:$0xff]   ;;  %v2316_v29 = vld [vmem:[%s2992_s0 + $0x178] sm:$0xff]   ;;  %v2317_v30 = vld [vmem:[%s2992_s0 + $0x60] sm:$0xff]  }
   0xa   :  { %2141 = vmatpush3.bf16.msra.mxu0 %v2292_v6  ;;  %2289 = vmatpush3.bf16.msra.mxu1 %v2292_v6  ;;  %v2318_v31 = vld [vmem:[%s2992_s0 + $0x180] sm:$0xff]   ;;  %v2319_v32 = vld [vmem:[%s2992_s0 + $0x68] sm:$0xff]   ;;  %v2321_v34 = vld [vmem:[%s2992_s0 + $0x70] sm:$0xff]  }
   0xb   :  { %v2320_v33 = vld [vmem:[%s2992_s0 + $0x188] sm:$0xff]   ;;  %v2322_v35 = vld [vmem:[%s2992_s0 + $0x190] sm:$0xff]   ;;  %v2323_v36 = vld [vmem:[%s2992_s0 + $0x78] sm:$0xff]  }
   0xc   :  { %v2324_v37 = vld [vmem:[%s2992_s0 + $0x198] sm:$0xff]   ;;  %v2325_v38 = vld [vmem:[%s2992_s0 + $0x80] sm:$0xff]   ;;  %v2327_v40 = vld [vmem:[%s2992_s0 + $0x88] sm:$0xff]  }
   0xd   :  { %2143 = vmatmul.mubr.msk.bf16.vlgmr.msra.gmra.mxu0 %vm534_vm2, %v2295_v8  ;;  %2215 = vmatmul.mubr.msk.bf16.vlgmr.msra.gmra.mxu1 %vm534_vm2, %v2296_v9  ;;  %v2326_v39 = vld [vmem:[%s2992_s0 + $0x1a0] sm:$0xff]   ;;  %v2328_v41 = vld [vmem:[%s2992_s0 + $0x1a8] sm:$0xff]   ;;  %v2329_v42 = vld [vmem:[%s2992_s0 + $0x90] sm:$0xff]  }
   0xe   :  { %2146 = vmatprep.mubr.msk.bf16.mxu0 %vm534_vm2, %v2297_v10  ;;  %2218 = vmatprep.mubr.msk.bf16.mxu1 %vm534_vm2, %v2298_v11  ;;  %v2330_v43 = vld [vmem:[%s2992_s0 + $0x1b0] sm:$0xff]   ;;  %v2331_v44 = vld [vmem:[%s2992_s0 + $0x98] sm:$0xff]   ;;  %v2333_v46 = vld [vmem:[%s2992_s0 + $0xa0] sm:$0xff]  }
   0xf   :  { %v2332_v45 = vld [vmem:[%s2992_s0 + $0x1b8] sm:$0xff]   ;;  %v2334_v47 = vld [vmem:[%s2992_s0 + $0x1c0] sm:$0xff]   ;;  %v2335_v48 = vld [vmem:[%s2992_s0 + $0xa8] sm:$0xff]  }
  0x10   :  { %v2336_v49 = vld [vmem:[%s2992_s0 + $0x1c8] sm:$0xff]   ;;  %v2337_v50 = vld [vmem:[%s2992_s0 + $0xb0] sm:$0xff]   ;;  %v2339_v52 = vld [vmem:[%s2992_s0 + $0xb8] sm:$0xff]  }
  0x11   :  { %v2338_v51 = vld [vmem:[%s2992_s0 + $0x1d0] sm:$0xff]   ;;  %v2340_v53 = vld [vmem:[%s2992_s0 + $0x1d8] sm:$0xff]   ;;  %v2341_v54 = vld [vmem:[%s2992_s0 + $0xc0] sm:$0xff]  }
  0x12   :  { %v2342_v55 = vld [vmem:[%s2992_s0 + $0x1e0] sm:$0xff]   ;;  %v2343_v56 = vld [vmem:[%s2992_s0 + $0xc8] sm:$0xff]   ;;  %v2345_v58 = vld [vmem:[%s2992_s0 + $0xd0] sm:$0xff]  }
  0x13   :  { %v2344_v57 = vld [vmem:[%s2992_s0 + $0x1e8] sm:$0xff]   ;;  %v2346_v59 = vld [vmem:[%s2992_s0 + $0x1f0] sm:$0xff]   ;;  %v2347_v60 = vld [vmem:[%s2992_s0 + $0xd8] sm:$0xff]  }
  0x14   :  { %v2348_v61 = vld [vmem:[%s2992_s0 + $0x1f8] sm:$0xff]   ;;  %v2349_v62 = vld [vmem:[%s2992_s0 + $0xe0] sm:$0xff]   ;;  %v2351_v0 = vld [vmem:[%s2992_s0 + $0xe8] sm:$0xff]  }
  0x15   :  { %2147 = vmatmul.mubr.msk.bf16.gmra.mxu0 %vm534_vm2, %v2299_v12  ;;  %2219 = vmatmul.mubr.msk.bf16.gmra.mxu1 %vm534_vm2, %v2300_v13  ;;  %v2350_v63 = vld [vmem:[%s2992_s0 + $0x200] sm:$0xff]   ;;  %v2352_v1 = vld [vmem:[%s2992_s0 + $0x208] sm:$0xff]   ;;  %v2353_v2 = vld [vmem:[%s2992_s0 + $0xf0] sm:$0xff]  }
  0x16   :  { %2150 = vmatprep.mubr.msk.bf16.mxu0 %vm534_vm2, %v2301_v14  ;;  %2222 = vmatprep.mubr.msk.bf16.mxu1 %vm534_vm2, %v2302_v15  ;;  %v2354_v3 = vld [vmem:[%s2992_s0 + $0x210] sm:$0xff]   ;;  %v2355_v4 = vld [vmem:[%s2992_s0 + $0xf8] sm:$0xff]   ;;  %v2357_v6 = vld [vmem:[%s2992_s0 + $0x100] sm:$0xff]  }
  0x17   :  { %v2356_v5 = vld [vmem:[%s2992_s0 + $0x218] sm:$0xff]   ;;  %v2358_v7 = vld [vmem:[%s2992_s0 + $0x220] sm:$0xff]   ;;  %v2359_v8 = vld [vmem:[%s2992_s0 + $0x108] sm:$0xff]  }
  0x18   :  { %v2360_v9 = vld [vmem:[%s2992_s0 + $0x228] sm:$0xff]   ;;  %v2361_v10 = vld [vmem:[%s2992_s0 + $0x110] sm:$0xff]   ;;  %v2363_v12 = vld [vmem:[%s2992_s0 + $0x118] sm:$0xff]  }
  0x19   :  { %v2362_v11 = vld [vmem:[%s2992_s0 + $0x230] sm:$0xff]   ;;  %v2364_v13 = vld [vmem:[%s2992_s0 + $0x238] sm:$0xff]  }
  0x1d   :  { %2151 = vmatmul.mubr.msk.bf16.gmra.mxu0 %vm534_vm2, %v2303_v16  ;;  %2223 = vmatmul.mubr.msk.bf16.gmra.mxu1 %vm534_vm2, %v2304_v17 }
  0x1e   :  { %2154 = vmatprep.mubr.msk.bf16.mxu0 %vm534_vm2, %v2305_v18  ;;  %2226 = vmatprep.mubr.msk.bf16.mxu1 %vm534_vm2, %v2306_v19 }
  0x25   :  { %2155 = vmatmul.mubr.msk.bf16.gmra.mxu0 %vm534_vm2, %v2307_v20  ;;  %2227 = vmatmul.mubr.msk.bf16.gmra.mxu1 %vm534_vm2, %v2308_v21 }
  0x26   :  { %2158 = vmatprep.mubr.msk.bf16.mxu0 %vm534_vm2, %v2309_v22  ;;  %2230 = vmatprep.mubr.msk.bf16.mxu1 %vm534_vm2, %v2310_v23 }
  0x2d   :  { %2159 = vmatmul.mubr.msk.bf16.gmra.mxu0 %vm534_vm2, %v2311_v24  ;;  %2231 = vmatmul.mubr.msk.bf16.gmra.mxu1 %vm534_vm2, %v2312_v25 }
  0x2e   :  { %2162 = vmatprep.mubr.msk.bf16.mxu0 %vm534_vm2, %v2313_v26  ;;  %2234 = vmatprep.mubr.msk.bf16.mxu1 %vm534_vm2, %v2314_v27 }
  0x35   :  { %2163 = vmatmul.mubr.msk.bf16.gmra.mxu0 %vm534_vm2, %v2315_v28  ;;  %2235 = vmatmul.mubr.msk.bf16.gmra.mxu1 %vm534_vm2, %v2316_v29 }
  0x36   :  { %2166 = vmatprep.mubr.msk.bf16.mxu0 %vm534_vm2, %v2317_v30  ;;  %2238 = vmatprep.mubr.msk.bf16.mxu1 %vm534_vm2, %v2318_v31 }
  0x3d   :  { %2167 = vmatmul.mubr.msk.bf16.gmra.mxu0 %vm534_vm2, %v2319_v32  ;;  %2239 = vmatmul.mubr.msk.bf16.gmra.mxu1 %vm534_vm2, %v2320_v33 }
  0x3e   :  { %2170 = vmatprep.mubr.msk.bf16.mxu0 %vm534_vm2, %v2321_v34  ;;  %2242 = vmatprep.mubr.msk.bf16.mxu1 %vm534_vm2, %v2322_v35 }
  0x45   :  { %2171 = vmatmul.mubr.msk.bf16.gmra.mxu0 %vm534_vm2, %v2323_v36  ;;  %2243 = vmatmul.mubr.msk.bf16.gmra.mxu1 %vm534_vm2, %v2324_v37 }
  0x46   :  { %2174 = vmatprep.mubr.msk.bf16.mxu0 %vm534_vm2, %v2325_v38  ;;  %2246 = vmatprep.mubr.msk.bf16.mxu1 %vm534_vm2, %v2326_v39 }
  0x4d   :  { %2175 = vmatmul.mubr.msk.bf16.gmra.mxu0 %vm534_vm2, %v2327_v40  ;;  %2247 = vmatmul.mubr.msk.bf16.gmra.mxu1 %vm534_vm2, %v2328_v41 }
  0x4e   :  { %2178 = vmatprep.mubr.msk.bf16.mxu0 %vm534_vm2, %v2329_v42  ;;  %2250 = vmatprep.mubr.msk.bf16.mxu1 %vm534_vm2, %v2330_v43 }
  0x55   :  { %2179 = vmatmul.mubr.msk.bf16.gmra.mxu0 %vm534_vm2, %v2331_v44  ;;  %2251 = vmatmul.mubr.msk.bf16.gmra.mxu1 %vm534_vm2, %v2332_v45 }
  0x56   :  { %2182 = vmatprep.mubr.msk.bf16.mxu0 %vm534_vm2, %v2333_v46  ;;  %2254 = vmatprep.mubr.msk.bf16.mxu1 %vm534_vm2, %v2334_v47 }
  0x5d   :  { %2183 = vmatmul.mubr.msk.bf16.gmra.mxu0 %vm534_vm2, %v2335_v48  ;;  %2255 = vmatmul.mubr.msk.bf16.gmra.mxu1 %vm534_vm2, %v2336_v49 }
  0x5e   :  { %2186 = vmatprep.mubr.msk.bf16.mxu0 %vm534_vm2, %v2337_v50  ;;  %2258 = vmatprep.mubr.msk.bf16.mxu1 %vm534_vm2, %v2338_v51 }
  0x65   :  { %2187 = vmatmul.mubr.msk.bf16.gmra.mxu0 %vm534_vm2, %v2339_v52  ;;  %2259 = vmatmul.mubr.msk.bf16.gmra.mxu1 %vm534_vm2, %v2340_v53 }
  0x66   :  { %2190 = vmatprep.mubr.msk.bf16.mxu0 %vm534_vm2, %v2341_v54  ;;  %2262 = vmatprep.mubr.msk.bf16.mxu1 %vm534_vm2, %v2342_v55 }
  0x6d   :  { %2191 = vmatmul.mubr.msk.bf16.gmra.mxu0 %vm534_vm2, %v2343_v56  ;;  %2263 = vmatmul.mubr.msk.bf16.gmra.mxu1 %vm534_vm2, %v2344_v57 }
  0x6e   :  { %2194 = vmatprep.mubr.msk.bf16.mxu0 %vm534_vm2, %v2345_v58  ;;  %2266 = vmatprep.mubr.msk.bf16.mxu1 %vm534_vm2, %v2346_v59 }
  0x75   :  { %2195 = vmatmul.mubr.msk.bf16.gmra.mxu0 %vm534_vm2, %v2347_v60  ;;  %2267 = vmatmul.mubr.msk.bf16.gmra.mxu1 %vm534_vm2, %v2348_v61 }
  0x76   :  { %2198 = vmatprep.mubr.msk.bf16.mxu0 %vm534_vm2, %v2349_v62  ;;  %2270 = vmatprep.mubr.msk.bf16.mxu1 %vm534_vm2, %v2350_v63 }
  0x7d   :  { %2199 = vmatmul.mubr.msk.bf16.gmra.mxu0 %vm534_vm2, %v2351_v0  ;;  %2271 = vmatmul.mubr.msk.bf16.gmra.mxu1 %vm534_vm2, %v2352_v1 }
  0x7e   :  { %2202 = vmatprep.mubr.msk.bf16.mxu0 %vm534_vm2, %v2353_v2  ;;  %2274 = vmatprep.mubr.msk.bf16.mxu1 %vm534_vm2, %v2354_v3 }
  0x85   :  { %2203 = vmatmul.mubr.msk.bf16.gmra.mxu0 %vm534_vm2, %v2355_v4  ;;  %2275 = vmatmul.mubr.msk.bf16.gmra.mxu1 %vm534_vm2, %v2356_v5 }
  0x86   :  { %2206 = vmatprep.mubr.msk.bf16.mxu0 %vm534_vm2, %v2357_v6  ;;  %2278 = vmatprep.mubr.msk.bf16.mxu1 %vm534_vm2, %v2358_v7 }
  0x8d   :  { %2207 = vmatmul.mubr.msk.bf16.gmra.mxu0 %vm534_vm2, %v2359_v8  ;;  %2279 = vmatmul.mubr.msk.bf16.gmra.mxu1 %vm534_vm2, %v2360_v9 }
  0x8e   :  { %2210 = vmatprep.mubr.msk.bf16.mxu0 %vm534_vm2, %v2361_v10  ;;  %2282 = vmatprep.mubr.msk.bf16.mxu1 %vm534_vm2, %v2362_v11 }
  0x95   :  { %2211 = vmatmul.mubr.msk.bf16.gmra.mxu0 %vm534_vm2, %v2363_v12  ;;  %2283 = vmatmul.mubr.msk.bf16.gmra.mxu1 %vm534_vm2, %v2364_v13 }
  0xcd   :  { %v2680_v14 = vpop.f32.mrf.mxu0  ;;  %v2682_v15 = vpop.f32.mrf.mxu1 }
  0xcf   :  { %v2684_v16 = vpop.f32.mrf.mxu0  ;;  %v2686_v17 = vpop.f32.mrf.mxu1 }
  0xd1   :  { %v2688_v18 = vpop.f32.mrf.mxu0  ;;  %v2690_v19 = vpop.f32.mrf.mxu1 }
  0xd3   :  { %v2692_v20 = vpop.f32.mrf.mxu0  ;;  %v2694_v21 = vpop.f32.mrf.mxu1 }
  0xd5   :  { %v2696_v22 = vpop.f32.mrf.mxu0  ;;  %v2698_v23 = vpop.f32.mrf.mxu1 }
  0xd7   :  { %v2700_v24 = vpop.f32.mrf.mxu0  ;;  %v2702_v25 = vpop.f32.mrf.mxu1 }
  0xd9   :  { %v2704_v26 = vpop.f32.mrf.mxu0  ;;  %v2706_v27 = vpop.f32.mrf.mxu1 }
  0xdb   :  { %v2708_v28 = vpop.f32.mrf.mxu0  ;;  %v2710_v29 = vpop.f32.mrf.mxu1 }
  0xdd   :  { %v2712_v30 = vpop.f32.mrf.mxu0  ;;  %v2714_v31 = vpop.f32.mrf.mxu1 }
  0xdf   :  { %v2716_v32 = vpop.f32.mrf.mxu0  ;;  %v2718_v33 = vpop.f32.mrf.mxu1 }
  0xe1   :  { %v2720_v34 = vpop.f32.mrf.mxu0  ;;  %v2722_v35 = vpop.f32.mrf.mxu1 }
  0xe3   :  { %v2724_v36 = vpop.f32.mrf.mxu0  ;;  %v2726_v37 = vpop.f32.mrf.mxu1 }
  0xe5   :  { %v2728_v38 = vpop.f32.mrf.mxu0  ;;  %v2730_v39 = vpop.f32.mrf.mxu1 }
  0xe7   :  { %v2732_v40 = vpop.f32.mrf.mxu0  ;;  %v2734_v41 = vpop.f32.mrf.mxu1 }
  0xe9   :  { %v2736_v42 = vpop.f32.mrf.mxu0  ;;  %v2738_v43 = vpop.f32.mrf.mxu1 }
  0xeb   :  { %v2740_v44 = vpop.f32.mrf.mxu0  ;;  %v2742_v45 = vpop.f32.mrf.mxu1 }
  0xed   :  { %v2744_v46 = vpop.f32.mrf.mxu0  ;;  %v2746_v47 = vpop.f32.mrf.mxu1 }
  0xef   :  { %v2748_v48 = vpop.f32.mrf.mxu0  ;;  %v2750_v49 = vpop.f32.mrf.mxu1 }
  0xf1   :  { %v2752_v50 = vpop.f32.mrf.mxu0  ;;  %v2754_v51 = vpop.f32.mrf.mxu1 }
  0xf3   :  { %v2756_v52 = vpop.f32.mrf.mxu0  ;;  %v2758_v53 = vpop.f32.mrf.mxu1 }
  0xf5   :  { %v2760_v54 = vpop.f32.mrf.mxu0  ;;  %v2762_v55 = vpop.f32.mrf.mxu1 }
  0xf7   :  { %v2764_v56 = vpop.f32.mrf.mxu0  ;;  %v2766_v57 = vpop.f32.mrf.mxu1 }
  0xf9   :  { %v2768_v58 = vpop.f32.mrf.mxu0  ;;  %v2770_v59 = vpop.f32.mrf.mxu1 }
  0xfb   :  { %v2772_v60 = vpop.f32.mrf.mxu0  ;;  %v2774_v61 = vpop.f32.mrf.mxu1 }
  0xfd   :  { %v2776_v62 = vpop.f32.mrf.mxu0  ;;  %v2778_v63 = vpop.f32.mrf.mxu1 }
  0xfe   :  { %2995 = vst [vmem:[#allocation2_spill] sm:$0xff] %v2778_v63 }
  0xff   :  { %v2780_v0 = vpop.f32.mrf.mxu0  ;;  %v2782_v1 = vpop.f32.mrf.mxu1 }
 0x100   :  { %2996 = vst [vmem:[#allocation3_spill] sm:$0xff] %v2780_v0  ;;  %2997 = vst [vmem:[#allocation4_spill] sm:$0xff] %v2782_v1 }
 0x101   :  { %v2784_v2 = vpop.f32.mrf.mxu0  ;;  %v2786_v3 = vpop.f32.mrf.mxu1 }
 0x102   :  { %2998 = vst [vmem:[#allocation5_spill] sm:$0xff] %v2784_v2  ;;  %2999 = vst [vmem:[#allocation6_spill] sm:$0xff] %v2786_v3 }
 0x103   :  { %v2788_v4 = vpop.f32.mrf.mxu0  ;;  %v2790_v5 = vpop.f32.mrf.mxu1 }
 0x104   :  { %3000 = vst [vmem:[#allocation7_spill] sm:$0xff] %v2788_v4  ;;  %3001 = vst [vmem:[#allocation8_spill] sm:$0xff] %v2790_v5 }
 0x105   :  { %v2792_v6 = vpop.f32.mrf.mxu0  ;;  %v2794_v7 = vpop.f32.mrf.mxu1 }
 0x106   :  { %3002 = vst [vmem:[#allocation9_spill] sm:$0xff] %v2792_v6  ;;  %3003 = vst [vmem:[#allocation10_spill] sm:$0xff] %v2794_v7 }
 0x107   :  { %v2796_v8 = vpop.f32.mrf.mxu0  ;;  %v2798_v9 = vpop.f32.mrf.mxu1 }
 0x108   :  { %3004 = vst [vmem:[#allocation11_spill] sm:$0xff] %v2796_v8  ;;  %3005 = vst [vmem:[#allocation12_spill] sm:$0xff] %v2798_v9 }
 0x109   :  { %v2800_v10 = vpop.f32.mrf.mxu0  ;;  %v2802_v11 = vpop.f32.mrf.mxu1 }
 0x10a   :  { %3006 = vst [vmem:[#allocation13_spill] sm:$0xff] %v2800_v10  ;;  %3007 = vst [vmem:[#allocation14_spill] sm:$0xff] %v2802_v11 }
 0x10b   :  { %v2804_v12 = vpop.f32.mrf.mxu0  ;;  %v2806_v13 = vpop.f32.mrf.mxu1 }
 0x10c   :  { %3008 = vst [vmem:[#allocation15_spill] sm:$0xff] %v2804_v12  ;;  %3009 = vst [vmem:[#allocation16_spill] sm:$0xff] %v2806_v13 }
 0x10d   :  { %v2808_v3 = vpop.f32.mrf.mxu0  ;;  %v2810_v4 = vpop.f32.mrf.mxu1 }
 0x10e   :  { %3010 = vst [vmem:[#allocation17_spill] sm:$0xff] %v2808_v3  ;;  %3011 = vst [vmem:[#allocation18_spill] sm:$0xff] %v2810_v4 }
 0x10f   :  { %v2812_v5 = vpop.f32.mrf.mxu0  ;;  %v2814_v6 = vpop.f32.mrf.mxu1 }
 0x110   :  { %3012 = vst [vmem:[#allocation19_spill] sm:$0xff] %v2812_v5  ;;  %3013 = vst [vmem:[#allocation20_spill] sm:$0xff] %v2814_v6 }
 0x111   :  { %v2816_v7 = vpop.f32.mrf.mxu0  ;;  %v2818_v8 = vpop.f32.mrf.mxu1 }
 0x112   :  { %3014 = vst [vmem:[#allocation21_spill] sm:$0xff] %v2816_v7  ;;  %3015 = vst [vmem:[#allocation22_spill] sm:$0xff] %v2818_v8  ;;  %v2831_v8 = vld [vmem:[%s2993_s2] ss:$0 sm:$0xff] }
 0x113   :  { %v2820_v9 = vpop.f32.mrf.mxu0  ;;  %v2822_v10 = vpop.f32.mrf.mxu1 }
 0x114   :  { %3016 = vst [vmem:[#allocation23_spill] sm:$0xff] %v2820_v9  ;;  %3017 = vst [vmem:[#allocation24_spill] sm:$0xff] %v2822_v10 }
 0x115   :  { %v2180_v11 = vpop.f32.mrf.mxu0  ;;  %v2252_v12 = vpop.f32.mrf.mxu1 }
 0x116   :  { %v1369_v13 = vmax.f32 %v2680_v14, %v2180_v11  ;;  %v1405_v3 = vmax.f32 %v2682_v15, %v2252_v12 }
 0x117   :  { %v936_v2 = vpop.f32.mrf.mxu0  ;;  %v1224_v4 = vpop.f32.mrf.mxu1 }
 0x118   :  { %v1441_v1 = vmax.f32 %v1369_v13, %v1405_v3  ;;  %v1367_v5 = vmax.f32 %v2684_v16, %v936_v2  ;;  %v1403_v6 = vmax.f32 %v2686_v17, %v1224_v4 }
 0x119   :  { %v2181_v9 = vpop.f32.mrf.mxu0  ;;  %v2253_v10 = vpop.f32.mrf.mxu1 }
 0x11a   :  { %v1370_v7 = vmax.f32 %v2688_v18, %v2181_v9  ;;  %v1406_v14 = vmax.f32 %v2690_v19, %v2253_v10  ;;  %v1439_v11 = vmax.f32 %v1367_v5, %v1403_v6  ;;  %v1484_v3 = vadd.f32 %v2831_v8, %v1441_v1 }
 0x11b   :  { %v939_v15 = vpop.f32.mrf.mxu0  ;;  %v1227_v12 = vpop.f32.mrf.mxu1 }
 0x11c   :  { %v1442_v13 = vmax.f32 %v1370_v7, %v1406_v14  ;;  %v1368_v16 = vmax.f32 %v2692_v20, %v939_v15  ;;  %v1404_v17 = vmax.f32 %v2694_v21, %v1227_v12  ;;  %v1482_v19 = vadd.f32 %v2831_v8, %v1439_v11 }
 0x11d   :  { %v2184_v2 = vpop.f32.mrf.mxu0  ;;  %v2256_v4 = vpop.f32.mrf.mxu1  ;;  %v1520_v10 = vmax.f32 %v1484_v3, 0.0 }
 0x11e   :  { %v1485_v0 = vadd.f32 %v2831_v8, %v1442_v13  ;;  %v1373_v63 = vmax.f32 %v2696_v22, %v2184_v2  ;;  %v1409_v18 = vmax.f32 %v2698_v23, %v2256_v4  ;;  %v1440_v5 = vmax.f32 %v1368_v16, %v1404_v17 }
 0x11f   :  { %v952_v6 = vpop.f32.mrf.mxu0  ;;  %v1240_v9 = vpop.f32.mrf.mxu1  ;;  %v1518_v2 = vmax.f32 %v1482_v19, 0.0 }
 0x120   :  { %v1521_v1 = vmax.f32 %v1485_v0, 0.0  ;;  %v1371_v7 = vmax.f32 %v2700_v24, %v952_v6  ;;  %v1407_v20 = vmax.f32 %v2702_v25, %v1240_v9  ;;  %v1483_v21 = vadd.f32 %v2831_v8, %v1440_v5 }
 0x121   :  { %v1445_v14 = vmax.f32 %v1373_v63, %v1409_v18  ;;  %v2185_v15 = vpop.f32.mrf.mxu0  ;;  %v2257_v12 = vpop.f32.mrf.mxu1 }
 0x122   :  { %v1965_v13 = vpack.c.bf16 %v1521_v1, %v1520_v10  ;;  %v1443_v22 = vmax.f32 %v1371_v7, %v1407_v20  ;;  %v1374_v23 = vmax.f32 %v2704_v26, %v2185_v15  ;;  %v1519_v11 = vmax.f32 %v1483_v21, 0.0 }
 0x123   :  { %v1410_v16 = vmax.f32 %v2706_v27, %v2257_v12  ;;  %v955_v17 = vpop.f32.mrf.mxu0  ;;  %v1243_v3 = vpop.f32.mrf.mxu1  ;;  %v1488_v0 = vadd.f32 %v2831_v8, %v1445_v14 }
 0x124   :  { %2047 = vst [vmem:[%s2994_s3 + $0x8] sm:$0xff] %v1965_v13   ;;  %v1372_v24 = vmax.f32 %v2708_v28, %v955_v17  ;;  %v1408_v25 = vmax.f32 %v2710_v29, %v1243_v3  ;;  %v1960_v63 = vpack.c.bf16 %v1519_v11, %v1518_v2  ;;  %v1486_v19 = vadd.f32 %v2831_v8, %v1443_v22 }
 0x125   :  { %v1446_v4 = vmax.f32 %v1374_v23, %v1410_v16  ;;  %v2188_v18 = vpop.f32.mrf.mxu0  ;;  %v2260_v26 = vpop.f32.mrf.mxu1  ;;  %v1524_v20 = vmax.f32 %v1488_v0, 0.0 }
 0x126   :  { %v1444_v5 = vmax.f32 %v1372_v24, %v1408_v25  ;;  %v1377_v27 = vmax.f32 %v2712_v30, %v2188_v18  ;;  %v1413_v6 = vmax.f32 %v2714_v31, %v2260_v26  ;;  %1961 = vst [vmem:[%s2994_s3] sm:$0xff] %v1960_v63   ;;  %v1522_v31 = vmax.f32 %v1486_v19, 0.0 }
 0x127   :  { %v1489_v28 = vadd.f32 %v2831_v8, %v1446_v4  ;;  %v968_v29 = vpop.f32.mrf.mxu0  ;;  %v1256_v9 = vpop.f32.mrf.mxu1 }
 0x128   :  { %v1487_v10 = vadd.f32 %v2831_v8, %v1444_v5  ;;  %v1375_v1 = vmax.f32 %v2716_v32, %v968_v29  ;;  %v1411_v7 = vmax.f32 %v2718_v33, %v1256_v9  ;;  %v1449_v14 = vmax.f32 %v1377_v27, %v1413_v6 }
 0x129   :  { %v1525_v21 = vmax.f32 %v1489_v28, 0.0  ;;  %v2189_v30 = vpop.f32.mrf.mxu0  ;;  %v2261_v15 = vpop.f32.mrf.mxu1 }
 0x12a   :  { %v1523_v12 = vmax.f32 %v1487_v10, 0.0  ;;  %v1378_v13 = vmax.f32 %v2720_v34, %v2189_v30  ;;  %v1447_v23 = vmax.f32 %v1375_v1, %v1411_v7  ;;  %v1414_v2 = vmax.f32 %v2722_v35, %v2261_v15 }
 0x12b   :  { %v1975_v22 = vpack.c.bf16 %v1525_v21, %v1524_v20  ;;  %v971_v11 = vpop.f32.mrf.mxu0  ;;  %v1259_v16 = vpop.f32.mrf.mxu1  ;;  %v1492_v33 = vadd.f32 %v2831_v8, %v1449_v14 }
 0x12c   :  { %v1970_v17 = vpack.c.bf16 %v1523_v12, %v1522_v31  ;;  %v1376_v32 = vmax.f32 %v2724_v36, %v971_v11  ;;  %v1450_v3 = vmax.f32 %v1378_v13, %v1414_v2  ;;  %v1412_v24 = vmax.f32 %v2726_v37, %v1259_v16 }
 0x12d   :  { %2049 = vst [vmem:[%s2994_s3 + $0x18] sm:$0xff] %v1975_v22   ;;  %v2192_v25 = vpop.f32.mrf.mxu0  ;;  %v2264_v34 = vpop.f32.mrf.mxu1  ;;  %v1490_v36 = vadd.f32 %v2831_v8, %v1447_v23  ;;  %v1528_v27 = vmax.f32 %v1492_v33, 0.0 }
 0x12e   :  { %2048 = vst [vmem:[%s2994_s3 + $0x10] sm:$0xff] %v1970_v17   ;;  %v1381_v35 = vmax.f32 %v2728_v38, %v2192_v25  ;;  %v1417_v63 = vmax.f32 %v2730_v39, %v2264_v34  ;;  %v1493_v0 = vadd.f32 %v2831_v8, %v1450_v3  ;;  %v1448_v4 = vmax.f32 %v1376_v32, %v1412_v24 }
 0x12f   :  { %v984_v18 = vpop.f32.mrf.mxu0  ;;  %v1272_v26 = vpop.f32.mrf.mxu1  ;;  %v1526_v10 = vmax.f32 %v1490_v36, 0.0 }
 0x130   :  { %v1453_v19 = vmax.f32 %v1381_v35, %v1417_v63  ;;  %v1379_v37 = vmax.f32 %v2732_v40, %v984_v18  ;;  %v1415_v5 = vmax.f32 %v2734_v41, %v1272_v26  ;;  %v1529_v6 = vmax.f32 %v1493_v0, 0.0 }
 0x131   :  { %v1491_v28 = vadd.f32 %v2831_v8, %v1448_v4  ;;  %v2193_v29 = vpop.f32.mrf.mxu0  ;;  %v2265_v38 = vpop.f32.mrf.mxu1 }
 0x132   :  { %v1382_v39 = vmax.f32 %v2736_v42, %v2193_v29  ;;  %v1418_v9 = vmax.f32 %v2738_v43, %v2265_v38  ;;  %v1985_v1 = vpack.c.bf16 %v1529_v6, %v1528_v27  ;;  %v1451_v20 = vmax.f32 %v1379_v37, %v1415_v5 }
 0x133   :  { %v1527_v7 = vmax.f32 %v1491_v28, 0.0  ;;  %v987_v21 = vpop.f32.mrf.mxu0  ;;  %v1275_v14 = vpop.f32.mrf.mxu1  ;;  %v1496_v40 = vadd.f32 %v2831_v8, %v1453_v19 }
 0x134   :  { %v1454_v30 = vmax.f32 %v1382_v39, %v1418_v9  ;;  %v1380_v41 = vmax.f32 %v2740_v44, %v987_v21  ;;  %2051 = vst [vmem:[%s2994_s3 + $0x28] sm:$0xff] %v1985_v1   ;;  %v1416_v42 = vmax.f32 %v2742_v45, %v1275_v14  ;;  %v1494_v44 = vadd.f32 %v2831_v8, %v1451_v20 }
 0x135   :  { %v1980_v15 = vpack.c.bf16 %v1527_v7, %v1526_v10  ;;  %v2196_v31 = vpop.f32.mrf.mxu0  ;;  %v2268_v43 = vpop.f32.mrf.mxu1  ;;  %v1532_v16 = vmax.f32 %v1496_v40, 0.0 }
 0x136   :  { %v1497_v12 = vadd.f32 %v2831_v8, %v1454_v30  ;;  %v1385_v13 = vmax.f32 %v2744_v46, %v2196_v31  ;;  %v1421_v22 = vmax.f32 %v2746_v47, %v2268_v43  ;;  %v1452_v23 = vmax.f32 %v1380_v41, %v1416_v42 }
 0x137   :  { %2050 = vst [vmem:[%s2994_s3 + $0x20] sm:$0xff] %v1980_v15   ;;  %v1000_v2 = vpop.f32.mrf.mxu0  ;;  %v1288_v11 = vpop.f32.mrf.mxu1  ;;  %v1530_v35 = vmax.f32 %v1494_v44, 0.0 }
 0x138   :  { %v1533_v17 = vmax.f32 %v1497_v12, 0.0  ;;  %v1383_v45 = vmax.f32 %v2748_v48, %v1000_v2  ;;  %v1419_v32 = vmax.f32 %v2750_v49, %v1288_v11  ;;  %v1495_v33 = vadd.f32 %v2831_v8, %v1452_v23 }
 0x139   :  { %v1457_v46 = vmax.f32 %v1385_v13, %v1421_v22  ;;  %v2197_v3 = vpop.f32.mrf.mxu0  ;;  %v2269_v47 = vpop.f32.mrf.mxu1  ;;  %v3018_v13 = vld [vmem:[#allocation2_spill] sm:$0xff] }
 0x13a   :  { %v1995_v24 = vpack.c.bf16 %v1533_v17, %v1532_v16  ;;  %v1455_v25 = vmax.f32 %v1383_v45, %v1419_v32  ;;  %v1386_v34 = vmax.f32 %v2752_v50, %v2197_v3  ;;  %v1531_v63 = vmax.f32 %v1495_v33, 0.0  ;;  %v3019_v17 = vld [vmem:[#allocation3_spill] sm:$0xff]  ;;  %v3020_v45 = vld [vmem:[#allocation4_spill] sm:$0xff] }
 0x13b   :  { %v1422_v36 = vmax.f32 %v2754_v51, %v2269_v47  ;;  %v1003_v0 = vpop.f32.mrf.mxu0  ;;  %v1291_v4 = vpop.f32.mrf.mxu1  ;;  %v1500_v26 = vadd.f32 %v2831_v8, %v1457_v46 }
 0x13c   :  { %2053 = vst [vmem:[%s2994_s3 + $0x38] sm:$0xff] %v1995_v24   ;;  %v1384_v48 = vmax.f32 %v2756_v52, %v1003_v0  ;;  %v1420_v49 = vmax.f32 %v2758_v53, %v1291_v4  ;;  %v1990_v18 = vpack.c.bf16 %v1531_v63, %v1530_v35  ;;  %v1498_v5 = vadd.f32 %v2831_v8, %v1455_v25  ;;  %v3021_v24 = vld [vmem:[#allocation5_spill] sm:$0xff] }
 0x13d   :  { %v1458_v19 = vmax.f32 %v1386_v34, %v1422_v36  ;;  %v2200_v37 = vpop.f32.mrf.mxu0  ;;  %v2272_v50 = vpop.f32.mrf.mxu1  ;;  %v1536_v9 = vmax.f32 %v1500_v26, 0.0  ;;  %v3022_v34 = vld [vmem:[#allocation6_spill] sm:$0xff] }
 0x13e   :  { %v1456_v27 = vmax.f32 %v1384_v48, %v1420_v49  ;;  %v1389_v51 = vmax.f32 %v2760_v54, %v2200_v37  ;;  %v1425_v6 = vmax.f32 %v2762_v55, %v2272_v50  ;;  %2052 = vst [vmem:[%s2994_s3 + $0x30] sm:$0xff] %v1990_v18   ;;  %v1534_v55 = vmax.f32 %v1498_v5, 0.0  ;;  %v3024_v5 = vld [vmem:[#allocation8_spill] sm:$0xff] }
 0x13f   :  { %v1501_v52 = vadd.f32 %v2831_v8, %v1458_v19  ;;  %v1016_v53 = vpop.f32.mrf.mxu0  ;;  %v1304_v28 = vpop.f32.mrf.mxu1  ;;  %v3023_v19 = vld [vmem:[#allocation7_spill] sm:$0xff] }
 0x140   :  { %v1499_v29 = vadd.f32 %v2831_v8, %v1456_v27  ;;  %v1387_v38 = vmax.f32 %v2764_v56, %v1016_v53  ;;  %v1423_v39 = vmax.f32 %v2766_v57, %v1304_v28  ;;  %v1461_v1 = vmax.f32 %v1389_v51, %v1425_v6  ;;  %v3025_v53 = vld [vmem:[#allocation9_spill] sm:$0xff] }
 0x141   :  { %v1537_v10 = vmax.f32 %v1501_v52, 0.0  ;;  %v2201_v54 = vpop.f32.mrf.mxu0  ;;  %v2273_v7 = vpop.f32.mrf.mxu1 }
 0x142   :  { %v1535_v20 = vmax.f32 %v1499_v29, 0.0  ;;  %v1390_v21 = vmax.f32 %v2768_v58, %v2201_v54  ;;  %v1459_v40 = vmax.f32 %v1387_v38, %v1423_v39  ;;  %v1426_v30 = vmax.f32 %v2770_v59, %v2273_v7  ;;  %v3026_v29 = vld [vmem:[#allocation10_spill] sm:$0xff] }
 0x143   :  { %v2005_v14 = vpack.c.bf16 %v1537_v10, %v1536_v9  ;;  %v1019_v41 = vpop.f32.mrf.mxu0  ;;  %v1307_v15 = vpop.f32.mrf.mxu1  ;;  %v1504_v57 = vadd.f32 %v2831_v8, %v1461_v1 }
 0x144   :  { %v2000_v42 = vpack.c.bf16 %v1535_v20, %v1534_v55  ;;  %v1388_v56 = vmax.f32 %v2772_v60, %v1019_v41  ;;  %v1462_v31 = vmax.f32 %v1390_v21, %v1426_v30  ;;  %v1424_v43 = vmax.f32 %v2774_v61, %v1307_v15  ;;  %v3027_v55 = vld [vmem:[#allocation11_spill] sm:$0xff]  ;;  %v3028_v21 = vld [vmem:[#allocation12_spill] sm:$0xff] }
 0x145   :  { %2055 = vst [vmem:[%s2994_s3 + $0x48] sm:$0xff] %v2005_v14   ;;  %v2204_v12 = vpop.f32.mrf.mxu0  ;;  %v2276_v58 = vpop.f32.mrf.mxu1  ;;  %v1502_v60 = vadd.f32 %v2831_v8, %v1459_v40  ;;  %v1540_v33 = vmax.f32 %v1504_v57, 0.0  ;;  %v3029_v57 = vld [vmem:[#allocation13_spill] sm:$0xff] }
 0x146   :  { %2054 = vst [vmem:[%s2994_s3 + $0x40] sm:$0xff] %v2000_v42   ;;  %v1393_v59 = vmax.f32 %v2776_v62, %v2204_v12  ;;  %v1429_v22 = vmax.f32 %v3018_v13, %v2276_v58  ;;  %v1505_v44 = vadd.f32 %v2831_v8, %v1462_v31  ;;  %v1460_v23 = vmax.f32 %v1388_v56, %v1424_v43  ;;  %v3030_v58 = vld [vmem:[#allocation14_spill] sm:$0xff] }
 0x147   :  { %v1032_v2 = vpop.f32.mrf.mxu0  ;;  %v1320_v11 = vpop.f32.mrf.mxu1  ;;  %v1538_v63 = vmax.f32 %v1502_v60, 0.0  ;;  %v3031_v60 = vld [vmem:[#allocation15_spill] sm:$0xff] }
 0x148   :  { %v1465_v16 = vmax.f32 %v1393_v59, %v1429_v22  ;;  %v1391_v61 = vmax.f32 %v3019_v17, %v1032_v2  ;;  %v1427_v32 = vmax.f32 %v3020_v45, %v1320_v11  ;;  %v1541_v46 = vmax.f32 %v1505_v44, 0.0 }
 0x149   :  { %v1503_v3 = vadd.f32 %v2831_v8, %v1460_v23  ;;  %v2205_v47 = vpop.f32.mrf.mxu0  ;;  %v2277_v62 = vpop.f32.mrf.mxu1  ;;  %v3032_v23 = vld [vmem:[#allocation16_spill] sm:$0xff] }
 0x14a   :  { %v1394_v25 = vmax.f32 %v3021_v24, %v2205_v47  ;;  %v1430_v35 = vmax.f32 %v3022_v34, %v2277_v62  ;;  %v2015_v36 = vpack.c.bf16 %v1541_v46, %v1540_v33  ;;  %v1463_v4 = vmax.f32 %v1391_v61, %v1427_v32  ;;  %v3033_v46 = vld [vmem:[#allocation17_spill] sm:$0xff]  ;;  %v3034_v47 = vld [vmem:[#allocation18_spill] sm:$0xff] }
 0x14b   :  { %v1539_v0 = vmax.f32 %v1503_v3, 0.0  ;;  %v1035_v48 = vpop.f32.mrf.mxu0  ;;  %v1323_v49 = vpop.f32.mrf.mxu1  ;;  %v1508_v18 = vadd.f32 %v2831_v8, %v1465_v16 }
 0x14c   :  { %v1466_v26 = vmax.f32 %v1394_v25, %v1430_v35  ;;  %v1392_v37 = vmax.f32 %v3023_v19, %v1035_v48  ;;  %2057 = vst [vmem:[%s2994_s3 + $0x58] sm:$0xff] %v2015_v36   ;;  %v1428_v27 = vmax.f32 %v3024_v5, %v1323_v49  ;;  %v1506_v39 = vadd.f32 %v2831_v8, %v1463_v4  ;;  %v3037_v5 = vld [vmem:[#allocation21_spill] sm:$0xff] }
 0x14d   :  { %v2010_v50 = vpack.c.bf16 %v1539_v0, %v1538_v63  ;;  %v2208_v51 = vpop.f32.mrf.mxu0  ;;  %v2280_v6 = vpop.f32.mrf.mxu1  ;;  %v1544_v54 = vmax.f32 %v1508_v18, 0.0  ;;  %v3035_v63 = vld [vmem:[#allocation19_spill] sm:$0xff]  ;;  %v3036_v0 = vld [vmem:[#allocation20_spill] sm:$0xff] }
 0x14e   :  { %v1509_v52 = vadd.f32 %v2831_v8, %v1466_v26  ;;  %v1397_v28 = vmax.f32 %v3025_v53, %v2208_v51  ;;  %v1433_v38 = vmax.f32 %v3026_v29, %v2280_v6  ;;  %v1464_v9 = vmax.f32 %v1392_v37, %v1428_v27 }
 0x14f   :  { %2056 = vst [vmem:[%s2994_s3 + $0x50] sm:$0xff] %v2010_v50   ;;  %v1048_v10 = vpop.f32.mrf.mxu0  ;;  %v1336_v1 = vpop.f32.mrf.mxu1  ;;  %v1542_v43 = vmax.f32 %v1506_v39, 0.0  ;;  %v3039_v39 = vld [vmem:[#allocation23_spill] sm:$0xff] }
 0x150   :  { %v1545_v7 = vmax.f32 %v1509_v52, 0.0  ;;  %v1395_v20 = vmax.f32 %v3027_v55, %v1048_v10  ;;  %v1431_v14 = vmax.f32 %v3028_v21, %v1336_v1  ;;  %v1507_v40 = vadd.f32 %v2831_v8, %v1464_v9  ;;  %v3038_v52 = vld [vmem:[#allocation22_spill] sm:$0xff] }
 0x151   :  { %v1469_v30 = vmax.f32 %v1397_v28, %v1433_v38  ;;  %v2209_v41 = vpop.f32.mrf.mxu0  ;;  %v2281_v15 = vpop.f32.mrf.mxu1 }
 0x152   :  { %v2025_v42 = vpack.c.bf16 %v1545_v7, %v1544_v54  ;;  %v1467_v56 = vmax.f32 %v1395_v20, %v1431_v14  ;;  %v1398_v31 = vmax.f32 %v3029_v57, %v2209_v41  ;;  %v1543_v12 = vmax.f32 %v1507_v40, 0.0  ;;  %v3040_v54 = vld [vmem:[#allocation24_spill] sm:$0xff] }
 0x153   :  { %v1434_v59 = vmax.f32 %v3030_v58, %v2281_v15  ;;  %v1051_v13 = vpop.f32.mrf.mxu0  ;;  %v1339_v22 = vpop.f32.mrf.mxu1  ;;  %v1512_v16 = vadd.f32 %v2831_v8, %v1469_v30 }
 0x154   :  { %2059 = vst [vmem:[%s2994_s3 + $0x68] sm:$0xff] %v2025_v42   ;;  %v1396_v44 = vmax.f32 %v3031_v60, %v1051_v13  ;;  %v1432_v2 = vmax.f32 %v3032_v23, %v1339_v22  ;;  %v2020_v11 = vpack.c.bf16 %v1543_v12, %v1542_v43  ;;  %v1510_v32 = vadd.f32 %v2831_v8, %v1467_v56 }
 0x155   :  { %v1470_v17 = vmax.f32 %v1398_v31, %v1434_v59  ;;  %v2212_v61 = vpop.f32.mrf.mxu0  ;;  %v2284_v45 = vpop.f32.mrf.mxu1  ;;  %v1548_v48 = vmax.f32 %v1512_v16, 0.0 }
 0x156   :  { %v1468_v33 = vmax.f32 %v1396_v44, %v1432_v2  ;;  %v1401_v3 = vmax.f32 %v3033_v46, %v2212_v61  ;;  %v1437_v62 = vmax.f32 %v3034_v47, %v2284_v45  ;;  %2058 = vst [vmem:[%s2994_s3 + $0x60] sm:$0xff] %v2020_v11   ;;  %v1546_v37 = vmax.f32 %v1510_v32, 0.0 }
 0x157   :  { %v1513_v24 = vadd.f32 %v2831_v8, %v1470_v17  ;;  %v1064_v25 = vpop.f32.mrf.mxu0  ;;  %v1352_v34 = vpop.f32.mrf.mxu1 }
 0x158   :  { %v1511_v35 = vadd.f32 %v2831_v8, %v1468_v33  ;;  %v1399_v36 = vmax.f32 %v3035_v63, %v1064_v25  ;;  %v1435_v4 = vmax.f32 %v3036_v0, %v1352_v34  ;;  %v1473_v18 = vmax.f32 %v1401_v3, %v1437_v62 }
 0x159   :  { %v1549_v49 = vmax.f32 %v1513_v24, 0.0  ;;  %v2213_v26 = vpop.f32.mrf.mxu0  ;;  %v2285_v19 = vpop.f32.mrf.mxu1 }
 0x15a   :  { %v1547_v50 = vmax.f32 %v1511_v35, 0.0  ;;  %v1402_v27 = vmax.f32 %v3037_v5, %v2213_v26  ;;  %v1471_v6 = vmax.f32 %v1399_v36, %v1435_v4  ;;  %v1438_v53 = vmax.f32 %v3038_v52, %v2285_v19 }
 0x15b   :  { %v2035_v51 = vpack.c.bf16 %v1549_v49, %v1548_v48  ;;  %v1067_v28 = vpop.f32.mrf.mxu0  ;;  %v1355_v29 = vpop.f32.mrf.mxu1  ;;  %v1516_v10 = vadd.f32 %v2831_v8, %v1473_v18 }
 0x15c   :  { %v2030_v38 = vpack.c.bf16 %v1547_v50, %v1546_v37  ;;  %v1400_v9 = vmax.f32 %v3039_v39, %v1067_v28  ;;  %v1474_v1 = vmax.f32 %v1402_v27, %v1438_v53  ;;  %v1436_v7 = vmax.f32 %v3040_v54, %v1355_v29 }
 0x15d   :  { %2061 = vst [vmem:[%s2994_s3 + $0x78] sm:$0xff] %v2035_v51   ;;  %v1514_v55 = vadd.f32 %v2831_v8, %v1471_v6  ;;  %v1552_v14 = vmax.f32 %v1516_v10, 0.0 }
 0x15e   :  { %2060 = vst [vmem:[%s2994_s3 + $0x70] sm:$0xff] %v2030_v38   ;;  %v1517_v20 = vadd.f32 %v2831_v8, %v1474_v1  ;;  %v1472_v21 = vmax.f32 %v1400_v9, %v1436_v7 }
 0x15f   :  { %v1550_v41 = vmax.f32 %v1514_v55, 0.0 }
 0x160   :  { %v1553_v40 = vmax.f32 %v1517_v20, 0.0  ;;  %v1515_v30 = vadd.f32 %v2831_v8, %v1472_v21 }
 0x162   :  { %v2045_v15 = vpack.c.bf16 %v1553_v40, %v1552_v14  ;;  %v1551_v42 = vmax.f32 %v1515_v30, 0.0 }
 0x164   :  { %2063 = vst [vmem:[%s2994_s3 + $0x88] sm:$0xff] %v2045_v15   ;;  %v2040_v56 = vpack.c.bf16 %v1551_v42, %v1550_v41 }
 0x166   :  { %2062 = vst [vmem:[%s2994_s3 + $0x80] sm:$0xff] %v2040_v56  }

// kernel: cnn_mnist_forward.4
= control target key start
LH: loop header
LB: loop body
LE: loop exit
PB: predicated region body
PF: predicated region fallthrough
CT: control target
= control target key end

     0   :  { %s684_s1 = inlined_call_operand.vmem [shape: bf16[256,128], index: 1, kind: input, shape index: {}]   ;;  %s685_s0 = inlined_call_operand.vmem [shape: bf16[4,32,256], index: 0, kind: input, shape index: {}]   ;;  %s686_s2 = inlined_call_operand.vmem [shape: f32[1,128], index: 2, kind: input, shape index: {}]   ;;  %s687_s3 = inlined_call_operand.vmem [shape: bf16[32,128], index: 3, kind: output, shape index: {}]  }
   0x1   :  { %v519_v0 = vld [vmem:[%s684_s1 + $0x78] sm:$0xff]   ;;  %v521_v2 = vld [vmem:[%s684_s1 + $0x70] sm:$0xff]   ;;  %v523_v4 = vld [vmem:[%s684_s1 + $0x68] sm:$0xff]  }
   0x2   :  { %v520_v1 = vld [vmem:[%s684_s1 + $0x38] sm:$0xff]   ;;  %439 = vmatprep.subr.bf16.mxu0 %v519_v0  ;;  %503 = vmatprep.subr.bf16.mxu1 %v519_v0  ;;  %v522_v3 = vld [vmem:[%s684_s1 + $0x30] sm:$0xff]   ;;  %v524_v5 = vld [vmem:[%s684_s1 + $0x28] sm:$0xff]  }
   0x3   :  { %440 = vmatpush3.bf16.msra.mxu0 %v520_v1  ;;  %511 = vmatpush3.bf16.msra.mxu1 %v520_v1  ;;  %v525_v6 = vld [vmem:[%s684_s1 + $0x60] sm:$0xff]   ;;  %v527_v8 = vld [vmem:[%s684_s1 + $0x58] sm:$0xff]   ;;  %v529_v10 = vld [vmem:[%s684_s1 + $0x50] sm:$0xff]  }
   0x4   :  { %441 = vmatprep.subr.bf16.mxu0 %v521_v2  ;;  %504 = vmatprep.subr.bf16.mxu1 %v521_v2  ;;  %v526_v7 = vld [vmem:[%s684_s1 + $0x20] sm:$0xff]   ;;  %v528_v9 = vld [vmem:[%s684_s1 + $0x18] sm:$0xff]   ;;  %v530_v13 = vld [vmem:[%s684_s1 + $0x10] sm:$0xff]  }
   0x5   :  { %v537_v11 = vld [vmem:[%s685_s0 + $0x4] ss:$8 sps:$4 sm:$0xff]   ;;  %v535_v18 = vld [vmem:[%s685_s0] ss:$8 sps:$4 sm:$0xff]   ;;  %v541_v20 = vld [vmem:[%s685_s0 + $0x14] ss:$8 sps:$4 sm:$0xff]  }
   0x6   :  { %v540_v12 = vld [vmem:[%s685_s0 + $0x44] ss:$8 sps:$4 sm:$0xff]   ;;  %271 = vmatprep.mubr.bf16.mxu0 %v537_v11  ;;  %v538_v19 = vld [vmem:[%s685_s0 + $0x40] ss:$8 sps:$4 sm:$0xff]   ;;  %v543_v21 = vld [vmem:[%s685_s0 + $0x54] ss:$8 sps:$4 sm:$0xff]  }
   0x7   :  { %442 = vmatpush3.bf16.msra.mxu0 %v522_v3  ;;  %512 = vmatpush3.bf16.msra.mxu1 %v522_v3  ;;  %v531_v14 = vld [vmem:[%s684_s1 + $0x48] sm:$0xff]   ;;  %v533_v16 = vld [vmem:[%s684_s1 + $0x40] sm:$0xff]   ;;  %v545_v22 = vld [vmem:[%s685_s0 + $0x10] ss:$8 sps:$4 sm:$0xff]  }
   0x8   :  { %443 = vmatprep.subr.bf16.mxu0 %v523_v4  ;;  %505 = vmatprep.subr.bf16.mxu1 %v523_v4  ;;  %v532_v15 = vld [vmem:[%s684_s1 + $0x8] sm:$0xff]   ;;  %v534_v17 = vld [vmem:[%s684_s1] sm:$0xff]   ;;  %v546_v23 = vld [vmem:[%s685_s0 + $0x50] ss:$8 sps:$4 sm:$0xff]  }
   0x9   :  { %303 = vmatprep.mubr.bf16.mxu1 %v540_v12  ;;  %v547_v24 = vld [vmem:[%s685_s0 + $0x24] ss:$8 sps:$4 sm:$0xff]   ;;  %v551_v26 = vld [vmem:[%s685_s0 + $0x20] ss:$8 sps:$4 sm:$0xff]   ;;  %v553_v28 = vld [vmem:[%s685_s0 + $0x34] ss:$8 sps:$4 sm:$0xff]  }
   0xa   :  { %v549_v25 = vld [vmem:[%s685_s0 + $0x64] ss:$8 sps:$4 sm:$0xff]   ;;  %v552_v27 = vld [vmem:[%s685_s0 + $0x60] ss:$8 sps:$4 sm:$0xff]   ;;  %v555_v29 = vld [vmem:[%s685_s0 + $0x74] ss:$8 sps:$4 sm:$0xff]  }
   0xb   :  { %444 = vmatpush3.bf16.msra.mxu0 %v524_v5  ;;  %513 = vmatpush3.bf16.msra.mxu1 %v524_v5  ;;  %v557_v30 = vld [vmem:[%s685_s0 + $0x30] ss:$8 sps:$4 sm:$0xff]   ;;  %v419_v1 = vld [vmem:[%s686_s2] ss:$0 sm:$0xff] }
   0xc   :  { %445 = vmatprep.subr.bf16.mxu0 %v525_v6  ;;  %506 = vmatprep.subr.bf16.mxu1 %v525_v6  ;;  %v558_v31 = vld [vmem:[%s685_s0 + $0x70] ss:$8 sps:$4 sm:$0xff]  }
   0xf   :  { %446 = vmatpush3.bf16.msra.mxu0 %v526_v7  ;;  %514 = vmatpush3.bf16.msra.mxu1 %v526_v7 }
  0x10   :  { %447 = vmatprep.subr.bf16.mxu0 %v527_v8  ;;  %507 = vmatprep.subr.bf16.mxu1 %v527_v8 }
  0x13   :  { %448 = vmatpush3.bf16.msra.mxu0 %v528_v9  ;;  %515 = vmatpush3.bf16.msra.mxu1 %v528_v9 }
  0x14   :  { %449 = vmatprep.subr.bf16.mxu0 %v529_v10  ;;  %508 = vmatprep.subr.bf16.mxu1 %v529_v10 }
  0x17   :  { %450 = vmatpush3.bf16.msra.mxu0 %v530_v13  ;;  %516 = vmatpush3.bf16.msra.mxu1 %v530_v13 }
  0x18   :  { %451 = vmatprep.subr.bf16.mxu0 %v531_v14  ;;  %509 = vmatprep.subr.bf16.mxu1 %v531_v14 }
  0x1b   :  { %452 = vmatpush3.bf16.msra.mxu0 %v532_v15  ;;  %517 = vmatpush3.bf16.msra.mxu1 %v532_v15 }
  0x1c   :  { %453 = vmatprep.subr.bf16.mxu0 %v533_v16  ;;  %510 = vmatprep.subr.bf16.mxu1 %v533_v16 }
  0x1f   :  { %454 = vmatpush3.bf16.msra.mxu0 %v534_v17  ;;  %518 = vmatpush3.bf16.msra.mxu1 %v534_v17 }
  0x22   :  { %272 = vmatmul.mubr.bf16.vlgmr.msra.gmra.mxu0 %v535_v18  ;;  %304 = vmatmul.mubr.bf16.vlgmr.msra.gmra.mxu1 %v538_v19 }
  0x23   :  { %279 = vmatprep.mubr.bf16.mxu0 %v541_v20  ;;  %311 = vmatprep.mubr.bf16.mxu1 %v543_v21 }
  0x2a   :  { %280 = vmatmul.mubr.bf16.gmra.mxu0 %v545_v22  ;;  %312 = vmatmul.mubr.bf16.gmra.mxu1 %v546_v23 }
  0x2b   :  { %287 = vmatprep.mubr.bf16.mxu0 %v547_v24  ;;  %319 = vmatprep.mubr.bf16.mxu1 %v549_v25 }
  0x32   :  { %288 = vmatmul.mubr.bf16.gmra.mxu0 %v551_v26  ;;  %320 = vmatmul.mubr.bf16.gmra.mxu1 %v552_v27 }
  0x33   :  { %295 = vmatprep.mubr.bf16.mxu0 %v553_v28  ;;  %327 = vmatprep.mubr.bf16.mxu1 %v555_v29 }
  0x3a   :  { %296 = vmatmul.mubr.bf16.gmra.mxu0 %v557_v30  ;;  %328 = vmatmul.mubr.bf16.gmra.mxu1 %v558_v31 }
  0xe2   :  { %v455_v32 = vpop.f32.mrf.mxu0  ;;  %v479_v33 = vpop.f32.mrf.mxu1 }
  0xe4   :  { %v456_v34 = vpop.f32.mrf.mxu0  ;;  %v480_v35 = vpop.f32.mrf.mxu1 }
  0xe5   :  { %v457_v52 = vadd.f32 %v456_v34, %v455_v32  ;;  %v481_v53 = vadd.f32 %v480_v35, %v479_v33 }
  0xe6   :  { %v458_v36 = vpop.f32.mrf.mxu0  ;;  %v482_v37 = vpop.f32.mrf.mxu1 }
  0xe8   :  { %v459_v38 = vpop.f32.mrf.mxu0  ;;  %v483_v39 = vpop.f32.mrf.mxu1 }
  0xe9   :  { %v460_v60 = vadd.f32 %v459_v38, %v458_v36  ;;  %v484_v63 = vadd.f32 %v483_v39, %v482_v37 }
  0xea   :  { %v461_v40 = vpop.f32.mrf.mxu0  ;;  %v485_v41 = vpop.f32.mrf.mxu1 }
  0xec   :  { %v462_v42 = vpop.f32.mrf.mxu0  ;;  %v486_v43 = vpop.f32.mrf.mxu1 }
  0xed   :  { %v463_v8 = vadd.f32 %v462_v42, %v461_v40  ;;  %v487_v12 = vadd.f32 %v486_v43, %v485_v41 }
  0xee   :  { %v464_v44 = vpop.f32.mrf.mxu0  ;;  %v488_v45 = vpop.f32.mrf.mxu1 }
  0xf0   :  { %v465_v46 = vpop.f32.mrf.mxu0  ;;  %v489_v47 = vpop.f32.mrf.mxu1 }
  0xf1   :  { %v466_v21 = vadd.f32 %v465_v46, %v464_v44  ;;  %v490_v22 = vadd.f32 %v489_v47, %v488_v45 }
  0xf2   :  { %v467_v48 = vpop.f32.mrf.mxu0  ;;  %v491_v49 = vpop.f32.mrf.mxu1 }
  0xf4   :  { %v468_v50 = vpop.f32.mrf.mxu0  ;;  %v492_v51 = vpop.f32.mrf.mxu1 }
  0xf5   :  { %v469_v54 = vadd.f32 %v468_v50, %v467_v48  ;;  %v493_v55 = vadd.f32 %v492_v51, %v491_v49 }
  0xf6   :  { %v470_v56 = vpop.f32.mrf.mxu0  ;;  %v494_v57 = vpop.f32.mrf.mxu1 }
  0xf7   :  { %v336_v58 = vmax.f32 %v457_v52, %v469_v54  ;;  %v340_v59 = vmax.f32 %v481_v53, %v493_v55 }
  0xf8   :  { %v471_v61 = vpop.f32.mrf.mxu0  ;;  %v495_v62 = vpop.f32.mrf.mxu1 }
  0xf9   :  { %v344_v0 = vmax.f32 %v336_v58, %v340_v59  ;;  %v472_v2 = vadd.f32 %v471_v61, %v470_v56  ;;  %v496_v3 = vadd.f32 %v495_v62, %v494_v57 }
  0xfa   :  { %v473_v4 = vpop.f32.mrf.mxu0  ;;  %v497_v5 = vpop.f32.mrf.mxu1 }
  0xfb   :  { %v337_v6 = vmax.f32 %v460_v60, %v472_v2  ;;  %v341_v7 = vmax.f32 %v484_v63, %v496_v3  ;;  %v355_v9 = vadd.f32 %v419_v1, %v344_v0 }
  0xfc   :  { %v474_v10 = vpop.f32.mrf.mxu0  ;;  %v498_v11 = vpop.f32.mrf.mxu1 }
  0xfd   :  { %v345_v13 = vmax.f32 %v337_v6, %v341_v7  ;;  %v475_v14 = vadd.f32 %v474_v10, %v473_v4  ;;  %v499_v15 = vadd.f32 %v498_v11, %v497_v5  ;;  %v359_v23 = vmax.f32 %v355_v9, 0.0 }
  0xfe   :  { %v476_v16 = vpop.f32.mrf.mxu0  ;;  %v500_v17 = vpop.f32.mrf.mxu1 }
  0xff   :  { %v356_v18 = vadd.f32 %v419_v1, %v345_v13  ;;  %v338_v19 = vmax.f32 %v463_v8, %v475_v14  ;;  %v342_v20 = vmax.f32 %v487_v12, %v499_v15 }
 0x100   :  { %v477_v24 = vpop.f32.mrf.mxu0  ;;  %v501_v25 = vpop.f32.mrf.mxu1 }
 0x101   :  { %v360_v26 = vmax.f32 %v356_v18, 0.0  ;;  %v346_v27 = vmax.f32 %v338_v19, %v342_v20  ;;  %v478_v28 = vadd.f32 %v477_v24, %v476_v16  ;;  %v502_v29 = vadd.f32 %v501_v25, %v500_v17 }
 0x103   :  { %v431_v30 = vpack.c.bf16 %v360_v26, %v359_v23  ;;  %v339_v31 = vmax.f32 %v466_v21, %v478_v28  ;;  %v343_v32 = vmax.f32 %v490_v22, %v502_v29  ;;  %v357_v33 = vadd.f32 %v419_v1, %v346_v27 }
 0x105   :  { %432 = vst [vmem:[%s687_s3] sm:$0xff] %v431_v30   ;;  %v347_v34 = vmax.f32 %v339_v31, %v343_v32  ;;  %v361_v36 = vmax.f32 %v357_v33, 0.0 }
 0x107   :  { %v358_v35 = vadd.f32 %v419_v1, %v347_v34 }
 0x109   :  { %v362_v37 = vmax.f32 %v358_v35, 0.0 }
 0x10b   :  { %v436_v38 = vpack.c.bf16 %v362_v37, %v361_v36 }
 0x10d   :  { %438 = vst [vmem:[%s687_s3 + $0x8] sm:$0xff] %v436_v38  }

// kernel: cnn_mnist_forward.5
= control target key start
LH: loop header
LB: loop body
LE: loop exit
PB: predicated region body
PF: predicated region fallthrough
CT: control target
= control target key end

     0   :  { %v598_v2 = vmov 0.0   ;;  %vm599_vm0 = vmmov 0   ;;  %v82_v16 = vlaneseq  ;;  %v600_v20 = vmov 1966171168   ;;  %s744_s0 = inlined_call_operand.vmem [shape: bf16[2,320], index: 0, kind: input, shape index: {}]   ;;  %s745_s1 = inlined_call_operand.vmem [shape: bf16[320,128], index: 1, kind: input, shape index: {}]   ;;  %s746_s2 = inlined_call_operand.vmem [shape: f32[1,128], index: 2, kind: input, shape index: {}]   ;;  %s747_s3 = inlined_call_operand.vmem [shape: bf16[128,128], index: 3, kind: input, shape index: {}]   ;;  %s748_s4 = inlined_call_operand.vmem [shape: f32[1,128], index: 4, kind: input, shape index: {}]   ;;  %s749_s5 = inlined_call_operand.hbm [shape: f32[2,128], index: 5, kind: output, shape index: {}]  }
   0x1   :  { %v544_v0 = vld [vmem:[%s745_s1 + $0x78] sm:$0xff]   ;;  %508 = vmatprep.subr.bf16.mxu1 %v598_v2  ;;  %v546_v3 = vld [vmem:[%s745_s1 + $0x70] sm:$0xff]   ;;  %516 = vmatprep.mubr.msk.bf16.mxu1 %vm599_vm0, %v598_v2  ;;  %v548_v5 = vld [vmem:[%s745_s1 + $0x68] sm:$0xff]   ;;  %v80_v21 = vunpack.c.l.s4 %v600_v20  ;;  %vm216_vm1 = vcmask 523264  }
   0x2   :  { %v545_v1 = vld [vmem:[%s745_s1 + $0x38] sm:$0xff]   ;;  %472 = vmatprep.subr.bf16.mxu0 %v544_v0  ;;  %v547_v4 = vld [vmem:[%s745_s1 + $0x30] sm:$0xff]   ;;  %v549_v6 = vld [vmem:[%s745_s1 + $0x28] sm:$0xff]   ;;  %v83_v22 = vshrl.u32 %v82_v16, 7 }
   0x3   :  { %473 = vmatpush3.bf16.msra.mxu0 %v545_v1  ;;  %v550_v7 = vld [vmem:[%s745_s1 + $0x60] sm:$0xff]   ;;  %v554_v8 = vld [vmem:[%s745_s1 + $0x98] sm:$0xff]   ;;  %v557_v11 = vld [vmem:[%s745_s1 + $0x90] sm:$0xff]   ;;  %v81_v25 = vunpack.c.0.s8 %v80_v21 }
   0x4   :  { %474 = vmatprep.subr.bf16.mxu0 %v546_v3  ;;  %v551_v9 = vld [vmem:[%s745_s1 + $0x20] sm:$0xff]   ;;  %v552_v10 = vld [vmem:[%s745_s1 + $0x58] sm:$0xff]   ;;  %509 = vmatpush3.bf16.msra.mxu1 %v554_v8  ;;  %v555_v13 = vld [vmem:[%s745_s1 + $0x50] sm:$0xff]  }
   0x5   :  { %510 = vmatprep.subr.bf16.mxu1 %v598_v2  ;;  %v553_v12 = vld [vmem:[%s745_s1 + $0x18] sm:$0xff]   ;;  %v560_v14 = vld [vmem:[%s745_s1 + $0x88] sm:$0xff]   ;;  %v556_v15 = vld [vmem:[%s745_s1 + $0x10] sm:$0xff]   ;;  %v84_v28 = vsub.s32 %v81_v25, %v83_v22 }
   0x6   :  { %v558_v17 = vld [vmem:[%s745_s1 + $0x48] sm:$0xff]   ;;  %v563_v18 = vld [vmem:[%s745_s1 + $0x80] sm:$0xff]   ;;  %v564_v31 = vld [vmem:[%s747_s3 + $0x38] sm:$0xff]  }
   0x7   :  { %475 = vmatpush3.bf16.msra.mxu0 %v547_v4  ;;  %v441_v19 = vld.sshfl [vmem:[%s744_s0] sm:$0x13 pattern:$0x75316420]  ;;  %v559_v23 = vld [vmem:[%s745_s1 + $0x8] sm:$0xff]  }
   0x8   :  { %476 = vmatprep.subr.bf16.mxu0 %v548_v5  ;;  %511 = vmatpush3.bf16.msra.mxu1 %v557_v11  ;;  %v78_v24 = vcombine.high %v441_v19, %v441_v19  ;;  %v561_v26 = vld [vmem:[%s745_s1 + $0x40] sm:$0xff]   ;;  %v85_v30 = vrot.slane %v441_v19, %v84_v28 }
   0x9   :  { %512 = vmatprep.subr.bf16.mxu1 %v598_v2  ;;  %v562_v27 = vld [vmem:[%s745_s1] sm:$0xff]  }
   0xa   :  { %v92_v29 = vrot.slane %v78_v24, %v84_v28 }
   0xb   :  { %477 = vmatpush3.bf16.msra.mxu0 %v549_v6 }
   0xc   :  { %478 = vmatprep.subr.bf16.mxu0 %v550_v7  ;;  %513 = vmatpush3.bf16.msra.mxu1 %v560_v14 }
   0xd   :  { %514 = vmatprep.subr.bf16.mxu1 %v598_v2 }
   0xf   :  { %479 = vmatpush3.bf16.msra.mxu0 %v551_v9 }
  0x10   :  { %480 = vmatprep.subr.bf16.mxu0 %v552_v10  ;;  %515 = vmatpush3.bf16.msra.mxu1 %v563_v18 }
  0x11   :  { %520 = vmatprep.subr.bf16.mxu1 %v598_v2 }
  0x13   :  { %481 = vmatpush3.bf16.msra.mxu0 %v553_v12 }
  0x14   :  { %482 = vmatprep.subr.bf16.mxu0 %v555_v13 }
  0x17   :  { %483 = vmatpush3.bf16.msra.mxu0 %v556_v15 }
  0x18   :  { %484 = vmatprep.subr.bf16.mxu0 %v558_v17 }
  0x1b   :  { %485 = vmatpush3.bf16.msra.mxu0 %v559_v23 }
  0x1c   :  { %486 = vmatprep.subr.bf16.mxu0 %v561_v26 }
  0x1d   :  { %10 = vsyncpa [#allocation3], 0  ;;  %252 = vmatprep.mubr.bf16.mxu0 %v92_v29  ;;  %v93_v32 = vcombine.high %v85_v30, %v85_v30  ;;  %v565_v33 = vld [vmem:[%s747_s3 + $0x30] sm:$0xff]   ;;  %v566_v34 = vld [vmem:[%s747_s3 + $0x28] sm:$0xff]   ;;  %vm413_vm2 = vcmask 1041408  }
  0x1e   :  { %v567_v35 = vld [vmem:[%s747_s3 + $0x20] sm:$0xff]   ;;  %v568_v36 = vld [vmem:[%s747_s3 + $0x18] sm:$0xff]   ;;  %v569_v37 = vld [vmem:[%s747_s3 + $0x10] sm:$0xff]  }
  0x1f   :  { %487 = vmatpush3.bf16.msra.mxu0 %v562_v27  ;;  %517 = vmatmul.mubr.msk.bf16.vlgmr.msra.gmra.mxu1 %vm216_vm1, %v93_v32  ;;  %v570_v38 = vld [vmem:[%s747_s3 + $0x8] sm:$0xff]   ;;  %v571_v39 = vld [vmem:[%s747_s3] sm:$0xff]  }
  0x20   :  { %521 = vmatpush3.bf16.msra.mxu1 %v564_v31  ;;  %536 = vmatprep.mubr.msk.bf16.mxu1 %vm599_vm0, %v598_v2  ;;  %v440_v44 = vld [vmem:[%s746_s2] ss:$0 sm:$0xff]  ;;  %s601_s2 = smov [#allocation2]  }
  0x21   :  { %522 = vmatprep.subr.bf16.mxu1 %v598_v2  ;;  %v463_v54 = vld [vmem:[%s748_s4] ss:$0 sm:$0xff]  ;;  %s432_s27 = sshll.u32 %s601_s2, 4  ;;  %s433_s27 = int_to_ptr.vmem [resolvable:$true] %s432_s27 }
  0x22   :  { %253 = vmatmul.mubr.bf16.vlgmr.msra.gmra.mxu0 %v85_v30  ;;  %s576_s4 = scalar_lea.vmem %s433_s27, 32  ;;  %p581_p1 = scmp.lt.s32.totalorder %s433_s27, %s433_s27 }
  0x23   :  { %p577_p0 = scmp.ne.s32.totalorder %s433_s27, %s576_s4  ;;  %p582_p2 = scmp.lt.s32.totalorder %s576_s4, %s576_s4 }
  0x24   :  { %523 = vmatpush3.bf16.msra.mxu1 %v565_v33 }
  0x25   :  { %524 = vmatprep.subr.bf16.mxu1 %v598_v2  ;;  %p583_p3 = por %p582_p2, %p581_p1 }
  0x27   :  { %p584_p4 = pnand %p583_p3, %p577_p0 }
  0x28   :  { %525 = vmatpush3.bf16.msra.mxu1 %v566_v34 }
  0x29   :  { %526 = vmatprep.subr.bf16.mxu1 %v598_v2 }
  0x2c   :  { %527 = vmatpush3.bf16.msra.mxu1 %v567_v35 }
  0x2d   :  { %528 = vmatprep.subr.bf16.mxu1 %v598_v2 }
  0x30   :  { %529 = vmatpush3.bf16.msra.mxu1 %v568_v36 }
  0x31   :  { %530 = vmatprep.subr.bf16.mxu1 %v598_v2 }
  0x34   :  { %531 = vmatpush3.bf16.msra.mxu1 %v569_v37 }
  0x35   :  { %532 = vmatprep.subr.bf16.mxu1 %v598_v2 }
  0x38   :  { %533 = vmatpush3.bf16.msra.mxu1 %v570_v38 }
  0x39   :  { %534 = vmatprep.subr.bf16.mxu1 %v598_v2 }
  0x3c   :  { %535 = vmatpush3.bf16.msra.mxu1 %v571_v39 }
  0xdf   :  { %v294_v40 = vpop.f32.mrf.mxu1 }
  0xe1   :  { %v518_v41 = vpop.f32.mrf.mxu1 }
  0xe2   :  { %v488_v42 = vpop.f32.mrf.mxu0 }
  0xe3   :  { %v297_v43 = vpop.f32.mrf.mxu1 }
  0xe4   :  { %v489_v45 = vpop.f32.mrf.mxu0 }
  0xe5   :  { %v490_v46 = vadd.f32 %v489_v45, %v488_v42  ;;  %v519_v47 = vpop.f32.mrf.mxu1 }
  0xe6   :  { %v491_v48 = vpop.f32.mrf.mxu0 }
  0xe7   :  { %v255_v49 = vadd.f32 %v490_v46, %v440_v44 }
  0xe8   :  { %v492_v50 = vpop.f32.mrf.mxu0 }
  0xe9   :  { %v295_v51 = vadd.f32 %v294_v40, %v255_v49 }
  0xeb   :  { %v300_v52 = vmax.f32 %v295_v51, 0.0 }
  0xed   :  { %v301_v53 = vpack.c.bf16 %v300_v52, %v300_v52 }
  0xef   :  { %537 = vmatmul.mubr.bf16.vlgmr.msra.gmra.mxu1 %v301_v53 }
 0x1af   :  { %v407_v55 = vpop.f32.mrf.mxu1 }
 0x1b0   :  { %v408_v56 = vadd.f32 %v463_v54, %v407_v55 }
 0x1b1   :  { %v538_v57 = vpop.f32.mrf.mxu1 }
 0x1b2   :  { %v414_v58 = vsel %vm413_vm2, %v408_v56, -inf }
 0x1b3   :  { %415 = vmax.xlane.f32.xlu0 %v414_v58  ;;  %v410_v59 = vpop.f32.mrf.mxu1 }
 0x1b5   :  { %v539_v60 = vpop.f32.mrf.mxu1 }
 0x23c   :  { %v416_v61 = vpop.xlane.xlu0 %415 }
 0x23d   :  { %v417_v62 = vsub.f32 %v408_v56, %v416_v61 }
 0x23f   :  { %v418_v63 = vmul.f32 1.442695, %v417_v62 }
 0x241   :  { %572 = vpow2.f32 %v418_v63 }
 0x24e   :  { %v573_v0 = vpop.eup %572 }
 0x24f   :  { %v420_v1 = vsel %vm413_vm2, %v573_v0, 0.0 }
 0x250   :  { %421 = vadd.xlane.f32.xlu0 %v420_v1 }
 0x2d9   :  { %v422_v2 = vpop.xlane.xlu0 %421 }
 0x2da   :  { %574 = vrcp.f32 %v422_v2 }
 0x2e7   :  { %v575_v3 = vpop.eup %574 }
 0x2e8   :  { %v424_v4 = vmul.f32 %v575_v3, %v573_v0 }
 0x2ea   :  { %425 = vst [vmem:[#allocation2] sm:$0x3] %v424_v4 }
 0x2eb   :  { %587 = shalt.err (!%p584_p4)
}
 0x2ec   :  { %435 = dma.vmem_to_hbm [thread:$0]  %s433_s27, 32, %s749_s5, [#allocation3]  }
 0x2ed   :  { %596 = dma.done.wait [#allocation3], 32  }
 0x2ee   :  { %597 = vsyncadd [#allocation3], 4294967264 }
 0x2ef   :  { %439 = vsyncpa [#allocation3], 1 }

</bundles_post_ra>
